<compile_context>
chip_gen: v7x
topology: tpu7x:2x2x1
jax: 0.10.0
libtpu: 0.0.40
codegen_flags: <defaults>
</compile_context>

<pallas_src>
import functools

import numpy as np
import jax
import jax.numpy as jnp
from jax import lax
from jax.experimental import pallas as pl
from jax.experimental.pallas import tpu as pltpu


# ----------------------------------------------------------------------------
# One-time host-side parameter preparation (outside the hot path, plain numpy)
# ----------------------------------------------------------------------------
def prepare_params(params, in_channels):
    """Fold im2col / pooling-parity / flatten orderings into padded matrices.

    Layouts produced (all lane-dense, MXU-ready):
      w1  (640, 256): conv1 as one matmul.  LHS lane = kh*128 + col*cin + ch,
                      out lane = (j%2)*128 + (j//2)*8 + c   (j = conv1 column)
      w2  (640, 128): conv2 as one matmul.  LHS lane = kh*128 + j2*8 + c,
                      out lane = (w%2)*64 + (w//2)*16 + oc  (w = conv2 column)
      wf1 (256, 128): fc1 with torch.flatten's (C,H,W) order folded in.
    """
    cin = in_channels
    w1 = np.asarray(params["conv1_w"], np.float32)   # (6, cin, 5, 5)
    b1 = np.asarray(params["conv1_b"], np.float32)   # (6,)
    w2 = np.asarray(params["conv2_w"], np.float32)   # (16, 6, 5, 5)
    b2 = np.asarray(params["conv2_b"], np.float32)   # (16,)
    fc1w = np.asarray(params["fc1_w"], np.float32)   # (120, 256)
    fc1b = np.asarray(params["fc1_b"], np.float32)
    fc2w = np.asarray(params["fc2_w"], np.float32)   # (84, 120)
    fc2b = np.asarray(params["fc2_b"], np.float32)
    fc3w = np.asarray(params["fc3_w"], np.float32)   # (nc, 84)
    fc3b = np.asarray(params["fc3_b"], np.float32)
    nc = fc3b.shape[0]
    assert nc <= 128 and 28 * cin <= 128
    assert w1.shape == (6, cin, 5, 5) and w2.shape == (16, 6, 5, 5)
    assert fc1w.shape == (120, 256) and fc2w.shape == (84, 120)

    # conv1 block-structured weight (640, 256)
    W1 = np.zeros((5 * 128, 256), np.float32)
    for kh in range(5):
        for kw in range(5):
            for j in range(24):                       # conv1 output column
                col = j + kw                          # image column
                r = kh * 128 + col * cin
                lo = (j % 2) * 128 + (j // 2) * 8
                W1[r:r + cin, lo:lo + 6] = w1[:, :, kh, kw].T
    b1v = np.zeros((1, 128), np.float32)
    for j2 in range(12):
        b1v[0, j2 * 8:j2 * 8 + 6] = b1

    # conv2 block-structured weight (640, 128)
    W2 = np.zeros((5 * 128, 128), np.float32)
    for kh in range(5):
        for kw in range(5):
            for w in range(8):                        # conv2 output column
                r = kh * 128 + (w + kw) * 8
                lo = (w % 2) * 64 + (w // 2) * 16
                W2[r:r + 6, lo:lo + 16] = w2[:, :, kh, kw].T
    b2v = np.zeros((1, 256), np.float32)
    for p in range(4):
        for q in range(4):
            b2v[0, p * 64 + q * 16:p * 64 + q * 16 + 16] = b2

    # fc1: feature lane p*64 + q*16 + oc  <->  torch flatten index oc*16 + p*4 + q
    Wf1 = np.zeros((256, 128), np.float32)
    for p in range(4):
        for q in range(4):
            for oc in range(16):
                Wf1[p * 64 + q * 16 + oc, :120] = fc1w[:, oc * 16 + p * 4 + q]
    bf1 = np.zeros((1, 128), np.float32); bf1[0, :120] = fc1b
    Wf2 = np.zeros((128, 128), np.float32); Wf2[:120, :84] = fc2w.T
    bf2 = np.zeros((1, 128), np.float32); bf2[0, :84] = fc2b
    Wf3 = np.zeros((128, 128), np.float32); Wf3[:84, :nc] = fc3w.T
    bf3 = np.zeros((1, 128), np.float32); bf3[0, :nc] = fc3b

    bf = lambda a: jnp.asarray(a, jnp.bfloat16)
    f32 = lambda a: jnp.asarray(a, jnp.float32)
    return {"w1": bf(W1), "b1": f32(b1v), "w2": bf(W2), "b2": f32(b2v),
            "wf1": bf(Wf1), "bf1": f32(bf1), "wf2": bf(Wf2), "bf2": f32(bf2),
            "wf3": bf(Wf3), "bf3": f32(bf3)}


# ----------------------------------------------------------------------------
# Shared math (used inside the Pallas kernel AND by the matched reference)
# ----------------------------------------------------------------------------
def _image_features(img, w1, b1, w2, b2):
    """img (28, 128) bf16 -> (1, 256) bf16 pooled/flattened conv features."""
    # conv1: one matmul over the 5 shifted row bands (128-aligned lane concat)
    lhs1 = jnp.concatenate([img[kh:kh + 24, :] for kh in range(5)], axis=-1)   # (24, 640)
    c1 = jnp.dot(lhs1, w1, preferred_element_type=jnp.float32)                 # (24, 256)
    # 2x2 max-pool: column pairs = the two 128-lane parity halves, row pairs explicit
    wm = jnp.maximum(c1[:, :128], c1[:, 128:])                                 # (24, 128)
    rows = [jnp.maximum(wm[2 * i:2 * i + 1, :], wm[2 * i + 1:2 * i + 2, :])
            for i in range(12)]
    p1 = jnp.concatenate(rows, axis=0)                                         # (12, 128)
    p1 = jnp.maximum(p1 + b1, 0.0).astype(jnp.bfloat16)                        # bias+ReLU hoisted

    # conv2: one matmul over the 5 shifted pooled row bands
    lhs2 = jnp.concatenate([p1[kh:kh + 8, :] for kh in range(5)], axis=-1)     # (8, 640)
    c2 = jnp.dot(lhs2, w2, preferred_element_type=jnp.float32)                 # (8, 128)
    wm2 = jnp.maximum(c2[:, :64], c2[:, 64:])                                  # (8, 64)
    frow = jnp.concatenate(
        [jnp.maximum(wm2[2 * p:2 * p + 1, :], wm2[2 * p + 1:2 * p + 2, :])
         for p in range(4)], axis=-1)                                          # (1, 256)
    # AdaptiveAvgPool2d((4,4)) is the identity on a 4x4 map -> skipped.
    return jnp.maximum(frow + b2, 0.0).astype(jnp.bfloat16)                    # bias+ReLU hoisted


def _head(feats, wf1, bf1, wf2, bf2, wf3, bf3):
    """feats (bt, 256) bf16 -> (bt, 128) f32 logits (fc1/fc2/fc3)."""
    h1 = jnp.maximum(jnp.dot(feats, wf1, preferred_element_type=jnp.float32) + bf1, 0.0)
    h2 = jnp.maximum(jnp.dot(h1.astype(jnp.bfloat16), wf2,
                             preferred_element_type=jnp.float32) + bf2, 0.0)
    return jnp.dot(h2.astype(jnp.bfloat16), wf3,
                   preferred_element_type=jnp.float32) + bf3


# ----------------------------------------------------------------------------
# Fused kernel: image -> logits, one pallas_call, batch-tiled parallel grid
# ----------------------------------------------------------------------------
def _lenet_kernel(x_ref, w1_ref, b1_ref, w2_ref, b2_ref,
                  wf1_ref, bf1_ref, wf2_ref, bf2_ref, wf3_ref, bf3_ref, o_ref):
    bt = x_ref.shape[0]
    w1 = w1_ref[...]
    b1 = b1_ref[...]
    w2 = w2_ref[...]
    b2 = b2_ref[...]
    frows = [_image_features(x_ref[b], w1, b1, w2, b2) for b in range(bt)]
    feats = jnp.concatenate(frows, axis=0)                                     # (bt, 256)
    o_ref[...] = _head(feats, wf1_ref[...], bf1_ref[...], wf2_ref[...],
                       bf2_ref[...], wf3_ref[...], bf3_ref[...])


def lenet_pallas(prep, x_prep, *, bt):
    """x_prep: (B_pad, 28, 128) bf16 -> (B_pad, 128) f32 logits (lane-padded)."""
    bp = x_prep.shape[0]
    grid_n = bp // bt
    const = lambda shape: pl.BlockSpec(shape, lambda i: (0, 0))
    out = pl.pallas_call(
        _lenet_kernel,
        out_shape=jax.ShapeDtypeStruct((grid_n, bt, 128), jnp.float32),
        grid=(grid_n,),
        in_specs=[
            pl.BlockSpec((bt, 28, 128), lambda i: (i, 0, 0)),
            const(prep["w1"].shape), const(prep["b1"].shape),
            const(prep["w2"].shape), const(prep["b2"].shape),
            const(prep["wf1"].shape), const(prep["bf1"].shape),
            const(prep["wf2"].shape), const(prep["bf2"].shape),
            const(prep["wf3"].shape), const(prep["bf3"].shape),
        ],
        out_specs=pl.BlockSpec((None, bt, 128), lambda i: (i, 0, 0)),
        compiler_params=pltpu.CompilerParams(dimension_semantics=("parallel",)),
    )(x_prep, prep["w1"], prep["b1"], prep["w2"], prep["b2"],
      prep["wf1"], prep["bf1"], prep["wf2"], prep["bf2"],
      prep["wf3"], prep["bf3"])
    return out.reshape(grid_n * bt, 128)


# ----------------------------------------------------------------------------
# Full _LeNet forward
# ----------------------------------------------------------------------------
def lenet_forward(prep, x_nchw, *, num_classes, num_estimators=1, use_pallas=True):
    # handle_dropout (eval): x = x.repeat(num_estimators, 1, 1, 1)
    if num_estimators > 1:
        x_nchw = jnp.tile(x_nchw, (num_estimators, 1, 1, 1))
    # TODO(synk): stochastic F.dropout not implemented; dropout_rate=0.0 => identity.
    B, cin, H, W = x_nchw.shape
    assert (H, W) == (28, 28), "fused AdaptiveAvgPool2d((4,4)) assumes 28x28 input"
    assert 28 * cin <= 128

    xt = jnp.transpose(x_nchw, (0, 2, 3, 1)).reshape(B, 28, 28 * cin)
    xt = jnp.pad(xt.astype(jnp.bfloat16), ((0, 0), (0, 0), (0, 128 - 28 * cin)))

    bt = max(1, min(8, B // 2))                 # batch tile; grid >= 2 when B >= 2
    b_pad = -(-B // bt) * bt
    if b_pad != B:
        xt = jnp.pad(xt, ((0, b_pad - B), (0, 0), (0, 0)))

    if use_pallas:
        logits = lenet_pallas(prep, xt, bt=bt)
    else:
        rows = [_image_features(xt[b], prep["w1"], prep["b1"],
                                prep["w2"], prep["b2"]) for b in range(B)]
        feats = jnp.concatenate(rows, axis=0)
        logits = _head(feats, prep["wf1"], prep["bf1"], prep["wf2"],
                       prep["bf2"], prep["wf3"], prep["bf3"])
    return logits[:B, :num_classes]


# ----------------------------------------------------------------------------
# Direct f32 reference of the PyTorch semantics (validation only)
# ----------------------------------------------------------------------------
def lenet_reference_f32(params, x, num_estimators=1):
    if num_estimators > 1:
        x = jnp.tile(x, (num_estimators, 1, 1, 1))
    x = x.astype(jnp.float32)

    def conv(x, w, b):
        y = lax.conv_general_dilated(x, w.astype(jnp.float32), (1, 1), "VALID",
                                     dimension_numbers=("NCHW", "OIHW", "NCHW"),
                                     precision=lax.Precision.HIGHEST)
        return y + b[None, :, None, None]

    def pool(x):
        B, C, H, W = x.shape
        return jnp.max(x.reshape(B, C, H // 2, 2, W // 2, 2), axis=(3, 5))

    out = pool(jnp.maximum(conv(x, params["conv1_w"], params["conv1_b"]), 0.0))
    out = pool(jnp.maximum(conv(out, params["conv2_w"], params["conv2_b"]), 0.0))
    # AdaptiveAvgPool2d((4, 4)) on a 4x4 map is the identity.
    B = out.shape[0]
    flat = out.reshape(B, -1)                       # torch.flatten: (C, H, W) order
    h = jnp.maximum(jnp.dot(flat, params["fc1_w"].T, precision=lax.Precision.HIGHEST)
                    + params["fc1_b"], 0.0)
    h = jnp.maximum(jnp.dot(h, params["fc2_w"].T, precision=lax.Precision.HIGHEST)
                    + params["fc2_b"], 0.0)
    return jnp.dot(h, params["fc3_w"].T, precision=lax.Precision.HIGHEST) + params["fc3_b"]


# ----------------------------------------------------------------------------
# Parameter init + self-test
# ----------------------------------------------------------------------------
def init_params(key, in_channels, num_classes):
    ks = jax.random.split(key, 10)
    s = 0.1
    return {
        "conv1_w": jax.random.normal(ks[0], (6, in_channels, 5, 5), jnp.float32) * s,
        "conv1_b": jax.random.normal(ks[1], (6,), jnp.float32) * s,
        "conv2_w": jax.random.normal(ks[2], (16, 6, 5, 5), jnp.float32) * s,
        "conv2_b": jax.random.normal(ks[3], (16,), jnp.float32) * s,
        "fc1_w": jax.random.normal(ks[4], (120, 256), jnp.float32) * s,   # torch (out, in)
        "fc1_b": jax.random.normal(ks[5], (120,), jnp.float32) * s,
        "fc2_w": jax.random.normal(ks[6], (84, 120), jnp.float32) * s,
        "fc2_b": jax.random.normal(ks[7], (84,), jnp.float32) * s,
        "fc3_w": jax.random.normal(ks[8], (num_classes, 84), jnp.float32) * s,
        "fc3_b": jax.random.normal(ks[9], (num_classes,), jnp.float32) * s,
    }


if __name__ == "__main__":
    key = jax.random.PRNGKey(0)
    k_param, k_x, k_x2 = jax.random.split(key, 3)

    in_channels, num_classes, batch = 3, 10, 2
    params = init_params(k_param, in_channels, num_classes)
    prep = prepare_params(params, in_channels)      # one-time, host-side

    fwd = jax.jit(functools.partial(lenet_forward, num_classes=num_classes,
                                    use_pallas=True))

    # --- small batch (bt=1, grid=2, megacore-parallel) ---
    x = jax.random.normal(k_x, (batch, in_channels, 28, 28), jnp.float32)
    out = jax.block_until_ready(fwd(prep, x))
    assert out.shape == (batch, num_classes), out.shape
    assert bool(jnp.all(jnp.isfinite(out)))

    # Matched reference: identical prepared bf16 weights and identical op graph,
    # only MXU accumulation order differs.
    ref_matched = lenet_forward(prep, x, num_classes=num_classes, use_pallas=False)
    d1 = float(jnp.max(jnp.abs(out - ref_matched)))
    assert jnp.allclose(out, ref_matched, atol=2e-3, rtol=2e-3), f"matched diff {d1}"

    # Semantic reference: direct f32 implementation of the PyTorch module
    # (loose tolerance covers the bf16 MXU path).
    ref_f32 = lenet_reference_f32(params, x)
    d2 = float(jnp.max(jnp.abs(out - ref_f32)))
    assert jnp.allclose(out, ref_f32, atol=8e-2, rtol=8e-2), f"f32 diff {d2}"

    # --- larger batch (bt=8, grid=2) exercises the batch-tiled path ---
    x16 = jax.random.normal(k_x2, (16, in_channels, 28, 28), jnp.float32)
    out16 = jax.block_until_ready(fwd(prep, x16))
    assert out16.shape == (16, num_classes)
    ref16 = lenet_forward(prep, x16, num_classes=num_classes, use_pallas=False)
    d3 = float(jnp.max(jnp.abs(out16 - ref16)))
    assert jnp.allclose(out16, ref16, atol=2e-3, rtol=2e-3), f"matched16 diff {d3}"

    print("KERNEL_OK")
</pallas_src>

<mosaic_0001>
module attributes {stable_mosaic.version = 11 : i64} {
  func.func @_lenet_kernel(%arg0: i32, %arg1: memref<1x28x128xbf16, #tpu.memory_space<vmem>>, %arg2: memref<640x256xbf16, #tpu.memory_space<vmem>>, %arg3: memref<1x128xf32, #tpu.memory_space<vmem>>, %arg4: memref<640x128xbf16, #tpu.memory_space<vmem>>, %arg5: memref<1x256xf32, #tpu.memory_space<vmem>>, %arg6: memref<256x128xbf16, #tpu.memory_space<vmem>>, %arg7: memref<1x128xf32, #tpu.memory_space<vmem>>, %arg8: memref<128x128xbf16, #tpu.memory_space<vmem>>, %arg9: memref<1x128xf32, #tpu.memory_space<vmem>>, %arg10: memref<128x128xbf16, #tpu.memory_space<vmem>>, %arg11: memref<1x128xf32, #tpu.memory_space<vmem>>, %arg12: memref<1x1x128xf32, #tpu.memory_space<vmem>>) attributes {dimension_semantics = [#tpu.dimension_semantics<parallel>], iteration_bounds = array<i64: 2>, scalar_prefetch = 0 : i64, scratch_operands = 0 : i64, tpu.core_type = #tpu.core_type<tc>, window_params = [{transform_indices = @transform_0, window_bounds = array<i64: 1, 28, 128>}, {pipeline_mode = #tpu.pipeline_mode<synchronous>, transform_indices = @transform_1, window_bounds = array<i64: 640, 256>}, {pipeline_mode = #tpu.pipeline_mode<synchronous>, transform_indices = @transform_2, window_bounds = array<i64: 1, 128>}, {pipeline_mode = #tpu.pipeline_mode<synchronous>, transform_indices = @transform_3, window_bounds = array<i64: 640, 128>}, {pipeline_mode = #tpu.pipeline_mode<synchronous>, transform_indices = @transform_4, window_bounds = array<i64: 1, 256>}, {pipeline_mode = #tpu.pipeline_mode<synchronous>, transform_indices = @transform_5, window_bounds = array<i64: 256, 128>}, {pipeline_mode = #tpu.pipeline_mode<synchronous>, transform_indices = @transform_6, window_bounds = array<i64: 1, 128>}, {pipeline_mode = #tpu.pipeline_mode<synchronous>, transform_indices = @transform_7, window_bounds = array<i64: 128, 128>}, {pipeline_mode = #tpu.pipeline_mode<synchronous>, transform_indices = @transform_8, window_bounds = array<i64: 1, 128>}, {pipeline_mode = #tpu.pipeline_mode<synchronous>, transform_indices = @transform_9, window_bounds = array<i64: 128, 128>}, {pipeline_mode = #tpu.pipeline_mode<synchronous>, transform_indices = @transform_10, window_bounds = array<i64: 1, 128>}, {transform_indices = @transform_11, window_bounds = array<i64: 1, 1, 128>}]} {
    %c0 = arith.constant 0 : index
    %c0_0 = arith.constant 0 : index
    %0 = vector.load %arg2[%c0, %c0_0] : memref<640x256xbf16, #tpu.memory_space<vmem>>, vector<640x256xbf16>
    %c0_1 = arith.constant 0 : index
    %c0_2 = arith.constant 0 : index
    %1 = vector.load %arg3[%c0_1, %c0_2] : memref<1x128xf32, #tpu.memory_space<vmem>>, vector<1x128xf32>
    %c0_3 = arith.constant 0 : index
    %c0_4 = arith.constant 0 : index
    %2 = vector.load %arg4[%c0_3, %c0_4] : memref<640x128xbf16, #tpu.memory_space<vmem>>, vector<640x128xbf16>
    %c0_5 = arith.constant 0 : index
    %c0_6 = arith.constant 0 : index
    %3 = vector.load %arg5[%c0_5, %c0_6] : memref<1x256xf32, #tpu.memory_space<vmem>>, vector<1x256xf32>
    %c0_7 = arith.constant 0 : index
    %c0_8 = arith.constant 0 : index
    %c0_9 = arith.constant 0 : index
    %4 = vector.load %arg1[%c0_7, %c0_8, %c0_9] : memref<1x28x128xbf16, #tpu.memory_space<vmem>>, vector<1x28x128xbf16>
    %5 = vector.shape_cast %4 : vector<1x28x128xbf16> to vector<28x128xbf16>
    %6 = vector.extract_strided_slice %5 {offsets = [0, 0], sizes = [24, 128], strides = [1, 1]} : vector<28x128xbf16> to vector<24x128xbf16>
    %7 = vector.extract_strided_slice %5 {offsets = [1, 0], sizes = [24, 128], strides = [1, 1]} : vector<28x128xbf16> to vector<24x128xbf16>
    %8 = vector.extract_strided_slice %5 {offsets = [2, 0], sizes = [24, 128], strides = [1, 1]} : vector<28x128xbf16> to vector<24x128xbf16>
    %9 = vector.extract_strided_slice %5 {offsets = [3, 0], sizes = [24, 128], strides = [1, 1]} : vector<28x128xbf16> to vector<24x128xbf16>
    %10 = vector.extract_strided_slice %5 {offsets = [4, 0], sizes = [24, 128], strides = [1, 1]} : vector<28x128xbf16> to vector<24x128xbf16>
    %11 = tpu.concatenate %6, %7, %8, %9, %10 in 1 : vector<24x128xbf16>, vector<24x128xbf16>, vector<24x128xbf16>, vector<24x128xbf16>, vector<24x128xbf16> -> vector<24x640xbf16>
    %cst = arith.constant dense<0.000000e+00> : vector<24x256xf32>
    %12 = tpu.matmul %11, %0, %cst {dimension_numbers = #tpu.dot_dimension_numbers<[1], [0], [0], [1], [0, 0, 1, 1], [], []>} : vector<24x640xbf16>, vector<640x256xbf16>, vector<24x256xf32> -> vector<24x256xf32>
    %13 = vector.extract_strided_slice %12 {offsets = [0, 0], sizes = [24, 128], strides = [1, 1]} : vector<24x256xf32> to vector<24x128xf32>
    %14 = vector.extract_strided_slice %12 {offsets = [0, 128], sizes = [24, 128], strides = [1, 1]} : vector<24x256xf32> to vector<24x128xf32>
    %15 = arith.maximumf %13, %14 : vector<24x128xf32>
    %16 = vector.extract_strided_slice %15 {offsets = [0, 0], sizes = [1, 128], strides = [1, 1]} : vector<24x128xf32> to vector<1x128xf32>
    %17 = vector.extract_strided_slice %15 {offsets = [1, 0], sizes = [1, 128], strides = [1, 1]} : vector<24x128xf32> to vector<1x128xf32>
    %18 = arith.maximumf %16, %17 : vector<1x128xf32>
    %19 = vector.extract_strided_slice %15 {offsets = [2, 0], sizes = [1, 128], strides = [1, 1]} : vector<24x128xf32> to vector<1x128xf32>
    %20 = vector.extract_strided_slice %15 {offsets = [3, 0], sizes = [1, 128], strides = [1, 1]} : vector<24x128xf32> to vector<1x128xf32>
    %21 = arith.maximumf %19, %20 : vector<1x128xf32>
    %22 = vector.extract_strided_slice %15 {offsets = [4, 0], sizes = [1, 128], strides = [1, 1]} : vector<24x128xf32> to vector<1x128xf32>
    %23 = vector.extract_strided_slice %15 {offsets = [5, 0], sizes = [1, 128], strides = [1, 1]} : vector<24x128xf32> to vector<1x128xf32>
    %24 = arith.maximumf %22, %23 : vector<1x128xf32>
    %25 = vector.extract_strided_slice %15 {offsets = [6, 0], sizes = [1, 128], strides = [1, 1]} : vector<24x128xf32> to vector<1x128xf32>
    %26 = vector.extract_strided_slice %15 {offsets = [7, 0], sizes = [1, 128], strides = [1, 1]} : vector<24x128xf32> to vector<1x128xf32>
    %27 = arith.maximumf %25, %26 : vector<1x128xf32>
    %28 = vector.extract_strided_slice %15 {offsets = [8, 0], sizes = [1, 128], strides = [1, 1]} : vector<24x128xf32> to vector<1x128xf32>
    %29 = vector.extract_strided_slice %15 {offsets = [9, 0], sizes = [1, 128], strides = [1, 1]} : vector<24x128xf32> to vector<1x128xf32>
    %30 = arith.maximumf %28, %29 : vector<1x128xf32>
    %31 = vector.extract_strided_slice %15 {offsets = [10, 0], sizes = [1, 128], strides = [1, 1]} : vector<24x128xf32> to vector<1x128xf32>
    %32 = vector.extract_strided_slice %15 {offsets = [11, 0], sizes = [1, 128], strides = [1, 1]} : vector<24x128xf32> to vector<1x128xf32>
    %33 = arith.maximumf %31, %32 : vector<1x128xf32>
    %34 = vector.extract_strided_slice %15 {offsets = [12, 0], sizes = [1, 128], strides = [1, 1]} : vector<24x128xf32> to vector<1x128xf32>
    %35 = vector.extract_strided_slice %15 {offsets = [13, 0], sizes = [1, 128], strides = [1, 1]} : vector<24x128xf32> to vector<1x128xf32>
    %36 = arith.maximumf %34, %35 : vector<1x128xf32>
    %37 = vector.extract_strided_slice %15 {offsets = [14, 0], sizes = [1, 128], strides = [1, 1]} : vector<24x128xf32> to vector<1x128xf32>
    %38 = vector.extract_strided_slice %15 {offsets = [15, 0], sizes = [1, 128], strides = [1, 1]} : vector<24x128xf32> to vector<1x128xf32>
    %39 = arith.maximumf %37, %38 : vector<1x128xf32>
    %40 = vector.extract_strided_slice %15 {offsets = [16, 0], sizes = [1, 128], strides = [1, 1]} : vector<24x128xf32> to vector<1x128xf32>
    %41 = vector.extract_strided_slice %15 {offsets = [17, 0], sizes = [1, 128], strides = [1, 1]} : vector<24x128xf32> to vector<1x128xf32>
    %42 = arith.maximumf %40, %41 : vector<1x128xf32>
    %43 = vector.extract_strided_slice %15 {offsets = [18, 0], sizes = [1, 128], strides = [1, 1]} : vector<24x128xf32> to vector<1x128xf32>
    %44 = vector.extract_strided_slice %15 {offsets = [19, 0], sizes = [1, 128], strides = [1, 1]} : vector<24x128xf32> to vector<1x128xf32>
    %45 = arith.maximumf %43, %44 : vector<1x128xf32>
    %46 = vector.extract_strided_slice %15 {offsets = [20, 0], sizes = [1, 128], strides = [1, 1]} : vector<24x128xf32> to vector<1x128xf32>
    %47 = vector.extract_strided_slice %15 {offsets = [21, 0], sizes = [1, 128], strides = [1, 1]} : vector<24x128xf32> to vector<1x128xf32>
    %48 = arith.maximumf %46, %47 : vector<1x128xf32>
    %49 = vector.extract_strided_slice %15 {offsets = [22, 0], sizes = [1, 128], strides = [1, 1]} : vector<24x128xf32> to vector<1x128xf32>
    %50 = vector.extract_strided_slice %15 {offsets = [23, 0], sizes = [1, 128], strides = [1, 1]} : vector<24x128xf32> to vector<1x128xf32>
    %51 = arith.maximumf %49, %50 : vector<1x128xf32>
    %52 = tpu.concatenate %18, %21, %24, %27, %30, %33, %36, %39, %42, %45, %48, %51 in 0 : vector<1x128xf32>, vector<1x128xf32>, vector<1x128xf32>, vector<1x128xf32>, vector<1x128xf32>, vector<1x128xf32>, vector<1x128xf32>, vector<1x128xf32>, vector<1x128xf32>, vector<1x128xf32>, vector<1x128xf32>, vector<1x128xf32> -> vector<12x128xf32>
    %53 = vector.broadcast %1 : vector<1x128xf32> to vector<12x128xf32>
    %54 = arith.addf %52, %53 : vector<12x128xf32>
    %cst_10 = arith.constant 0.000000e+00 : f32
    %55 = vector.broadcast %cst_10 : f32 to vector<12x128xf32>
    %56 = arith.maximumf %54, %55 : vector<12x128xf32>
    %57 = arith.truncf %56 : vector<12x128xf32> to vector<12x128xbf16>
    %58 = vector.extract_strided_slice %57 {offsets = [0, 0], sizes = [8, 128], strides = [1, 1]} : vector<12x128xbf16> to vector<8x128xbf16>
    %59 = vector.extract_strided_slice %57 {offsets = [1, 0], sizes = [8, 128], strides = [1, 1]} : vector<12x128xbf16> to vector<8x128xbf16>
    %60 = vector.extract_strided_slice %57 {offsets = [2, 0], sizes = [8, 128], strides = [1, 1]} : vector<12x128xbf16> to vector<8x128xbf16>
    %61 = vector.extract_strided_slice %57 {offsets = [3, 0], sizes = [8, 128], strides = [1, 1]} : vector<12x128xbf16> to vector<8x128xbf16>
    %62 = vector.extract_strided_slice %57 {offsets = [4, 0], sizes = [8, 128], strides = [1, 1]} : vector<12x128xbf16> to vector<8x128xbf16>
    %63 = tpu.concatenate %58, %59, %60, %61, %62 in 1 : vector<8x128xbf16>, vector<8x128xbf16>, vector<8x128xbf16>, vector<8x128xbf16>, vector<8x128xbf16> -> vector<8x640xbf16>
    %cst_11 = arith.constant dense<0.000000e+00> : vector<8x128xf32>
    %64 = tpu.matmul %63, %2, %cst_11 {dimension_numbers = #tpu.dot_dimension_numbers<[1], [0], [0], [1], [0, 0, 1, 1], [], []>} : vector<8x640xbf16>, vector<640x128xbf16>, vector<8x128xf32> -> vector<8x128xf32>
    %65 = vector.extract_strided_slice %64 {offsets = [0, 0], sizes = [8, 64], strides = [1, 1]} : vector<8x128xf32> to vector<8x64xf32>
    %66 = vector.extract_strided_slice %64 {offsets = [0, 64], sizes = [8, 64], strides = [1, 1]} : vector<8x128xf32> to vector<8x64xf32>
    %67 = arith.maximumf %65, %66 : vector<8x64xf32>
    %68 = vector.extract_strided_slice %67 {offsets = [0, 0], sizes = [1, 64], strides = [1, 1]} : vector<8x64xf32> to vector<1x64xf32>
    %69 = vector.extract_strided_slice %67 {offsets = [1, 0], sizes = [1, 64], strides = [1, 1]} : vector<8x64xf32> to vector<1x64xf32>
    %70 = arith.maximumf %68, %69 : vector<1x64xf32>
    %71 = vector.extract_strided_slice %67 {offsets = [2, 0], sizes = [1, 64], strides = [1, 1]} : vector<8x64xf32> to vector<1x64xf32>
    %72 = vector.extract_strided_slice %67 {offsets = [3, 0], sizes = [1, 64], strides = [1, 1]} : vector<8x64xf32> to vector<1x64xf32>
    %73 = arith.maximumf %71, %72 : vector<1x64xf32>
    %74 = vector.extract_strided_slice %67 {offsets = [4, 0], sizes = [1, 64], strides = [1, 1]} : vector<8x64xf32> to vector<1x64xf32>
    %75 = vector.extract_strided_slice %67 {offsets = [5, 0], sizes = [1, 64], strides = [1, 1]} : vector<8x64xf32> to vector<1x64xf32>
    %76 = arith.maximumf %74, %75 : vector<1x64xf32>
    %77 = vector.extract_strided_slice %67 {offsets = [6, 0], sizes = [1, 64], strides = [1, 1]} : vector<8x64xf32> to vector<1x64xf32>
    %78 = vector.extract_strided_slice %67 {offsets = [7, 0], sizes = [1, 64], strides = [1, 1]} : vector<8x64xf32> to vector<1x64xf32>
    %79 = arith.maximumf %77, %78 : vector<1x64xf32>
    %80 = tpu.concatenate %70, %73, %76, %79 in 1 : vector<1x64xf32>, vector<1x64xf32>, vector<1x64xf32>, vector<1x64xf32> -> vector<1x256xf32>
    %81 = arith.addf %80, %3 : vector<1x256xf32>
    %cst_12 = arith.constant 0.000000e+00 : f32
    %82 = vector.broadcast %cst_12 : f32 to vector<1x256xf32>
    %83 = arith.maximumf %81, %82 : vector<1x256xf32>
    %84 = arith.truncf %83 : vector<1x256xf32> to vector<1x256xbf16>
    %c0_13 = arith.constant 0 : index
    %c0_14 = arith.constant 0 : index
    %85 = vector.load %arg6[%c0_13, %c0_14] : memref<256x128xbf16, #tpu.memory_space<vmem>>, vector<256x128xbf16>
    %c0_15 = arith.constant 0 : index
    %c0_16 = arith.constant 0 : index
    %86 = vector.load %arg7[%c0_15, %c0_16] : memref<1x128xf32, #tpu.memory_space<vmem>>, vector<1x128xf32>
    %c0_17 = arith.constant 0 : index
    %c0_18 = arith.constant 0 : index
    %87 = vector.load %arg8[%c0_17, %c0_18] : memref<128x128xbf16, #tpu.memory_space<vmem>>, vector<128x128xbf16>
    %c0_19 = arith.constant 0 : index
    %c0_20 = arith.constant 0 : index
    %88 = vector.load %arg9[%c0_19, %c0_20] : memref<1x128xf32, #tpu.memory_space<vmem>>, vector<1x128xf32>
    %c0_21 = arith.constant 0 : index
    %c0_22 = arith.constant 0 : index
    %89 = vector.load %arg10[%c0_21, %c0_22] : memref<128x128xbf16, #tpu.memory_space<vmem>>, vector<128x128xbf16>
    %c0_23 = arith.constant 0 : index
    %c0_24 = arith.constant 0 : index
    %90 = vector.load %arg11[%c0_23, %c0_24] : memref<1x128xf32, #tpu.memory_space<vmem>>, vector<1x128xf32>
    %cst_25 = arith.constant dense<0.000000e+00> : vector<1x128xf32>
    %91 = tpu.matmul %84, %85, %cst_25 {dimension_numbers = #tpu.dot_dimension_numbers<[1], [0], [0], [1], [0, 0, 1, 1], [], []>} : vector<1x256xbf16>, vector<256x128xbf16>, vector<1x128xf32> -> vector<1x128xf32>
    %92 = arith.addf %91, %86 : vector<1x128xf32>
    %cst_26 = arith.constant 0.000000e+00 : f32
    %93 = vector.broadcast %cst_26 : f32 to vector<1x128xf32>
    %94 = arith.maximumf %92, %93 : vector<1x128xf32>
    %95 = arith.truncf %94 : vector<1x128xf32> to vector<1x128xbf16>
    %cst_27 = arith.constant dense<0.000000e+00> : vector<1x128xf32>
    %96 = tpu.matmul %95, %87, %cst_27 {dimension_numbers = #tpu.dot_dimension_numbers<[1], [0], [0], [1], [0, 0, 1, 1], [], []>} : vector<1x128xbf16>, vector<128x128xbf16>, vector<1x128xf32> -> vector<1x128xf32>
    %97 = arith.addf %96, %88 : vector<1x128xf32>
    %cst_28 = arith.constant 0.000000e+00 : f32
    %98 = vector.broadcast %cst_28 : f32 to vector<1x128xf32>
    %99 = arith.maximumf %97, %98 : vector<1x128xf32>
    %100 = arith.truncf %99 : vector<1x128xf32> to vector<1x128xbf16>
    %cst_29 = arith.constant dense<0.000000e+00> : vector<1x128xf32>
    %101 = tpu.matmul %100, %89, %cst_29 {dimension_numbers = #tpu.dot_dimension_numbers<[1], [0], [0], [1], [0, 0, 1, 1], [], []>} : vector<1x128xbf16>, vector<128x128xbf16>, vector<1x128xf32> -> vector<1x128xf32>
    %102 = arith.addf %101, %90 : vector<1x128xf32>
    %c0_30 = arith.constant 0 : index
    %c0_31 = arith.constant 0 : index
    %c0_32 = arith.constant 0 : index
    %103 = vector.load %arg12[%c0_30, %c0_31, %c0_32] : memref<1x1x128xf32, #tpu.memory_space<vmem>>, vector<1x1x128xf32>
    %104 = vector.shape_cast %103 : vector<1x1x128xf32> to vector<1x128xf32>
    %105 = vector.shape_cast %102 : vector<1x128xf32> to vector<1x1x128xf32>
    tpu.vector_store %arg12[%c0_30, %c0_31, %c0_32], %105 {strides = array<i32>} : memref<1x1x128xf32, #tpu.memory_space<vmem>>, vector<1x1x128xf32>,
    return
  }
  func.func @transform_0(%arg0: i32) -> (i32, i32, i32) {
    %c0_i32 = arith.constant 0 : i32
    %c0_i32_0 = arith.constant 0 : i32
    %c0_i32_1 = arith.constant 0 : i32
    return %arg0, %c0_i32, %c0_i32_0 : i32, i32, i32
  }
  func.func @transform_1(%arg0: i32) -> (i32, i32) {
    %c0_i32 = arith.constant 0 : i32
    %c0_i32_0 = arith.constant 0 : i32
    %c0_i32_1 = arith.constant 0 : i32
    return %c0_i32, %c0_i32_0 : i32, i32
  }
  func.func @transform_2(%arg0: i32) -> (i32, i32) {
    %c0_i32 = arith.constant 0 : i32
    %c0_i32_0 = arith.constant 0 : i32
    %c0_i32_1 = arith.constant 0 : i32
    return %c0_i32, %c0_i32_0 : i32, i32
  }
  func.func @transform_3(%arg0: i32) -> (i32, i32) {
    %c0_i32 = arith.constant 0 : i32
    %c0_i32_0 = arith.constant 0 : i32
    %c0_i32_1 = arith.constant 0 : i32
    return %c0_i32, %c0_i32_0 : i32, i32
  }
  func.func @transform_4(%arg0: i32) -> (i32, i32) {
    %c0_i32 = arith.constant 0 : i32
    %c0_i32_0 = arith.constant 0 : i32
    %c0_i32_1 = arith.constant 0 : i32
    return %c0_i32, %c0_i32_0 : i32, i32
  }
  func.func @transform_5(%arg0: i32) -> (i32, i32) {
    %c0_i32 = arith.constant 0 : i32
    %c0_i32_0 = arith.constant 0 : i32
    %c0_i32_1 = arith.constant 0 : i32
    return %c0_i32, %c0_i32_0 : i32, i32
  }
  func.func @transform_6(%arg0: i32) -> (i32, i32) {
    %c0_i32 = arith.constant 0 : i32
    %c0_i32_0 = arith.constant 0 : i32
    %c0_i32_1 = arith.constant 0 : i32
    return %c0_i32, %c0_i32_0 : i32, i32
  }
  func.func @transform_7(%arg0: i32) -> (i32, i32) {
    %c0_i32 = arith.constant 0 : i32
    %c0_i32_0 = arith.constant 0 : i32
    %c0_i32_1 = arith.constant 0 : i32
    return %c0_i32, %c0_i32_0 : i32, i32
  }
  func.func @transform_8(%arg0: i32) -> (i32, i32) {
    %c0_i32 = arith.constant 0 : i32
    %c0_i32_0 = arith.constant 0 : i32
    %c0_i32_1 = arith.constant 0 : i32
    return %c0_i32, %c0_i32_0 : i32, i32
  }
  func.func @transform_9(%arg0: i32) -> (i32, i32) {
    %c0_i32 = arith.constant 0 : i32
    %c0_i32_0 = arith.constant 0 : i32
    %c0_i32_1 = arith.constant 0 : i32
    return %c0_i32, %c0_i32_0 : i32, i32
  }
  func.func @transform_10(%arg0: i32) -> (i32, i32) {
    %c0_i32 = arith.constant 0 : i32
    %c0_i32_0 = arith.constant 0 : i32
    %c0_i32_1 = arith.constant 0 : i32
    return %c0_i32, %c0_i32_0 : i32, i32
  }
  func.func @transform_11(%arg0: i32) -> (i32, i32, i32) {
    %c0_i32 = arith.constant 0 : i32
    %c0_i32_0 = arith.constant 0 : i32
    %c0_i32_1 = arith.constant 0 : i32
    return %arg0, %c0_i32, %c0_i32_0 : i32, i32, i32
  }
}

</mosaic_0001>

<bundles_post_ra>
// kernel: lenet_forward.1
= control target key start
LH: loop header
LB: loop body
LE: loop exit
PB: predicated region body
PF: predicated region fallthrough
CT: control target
= control target key end

     0   :  { %16 = vsyncpa [#allocation3], 0  ;;  %s3324_s0 = inlined_call_operand.vmem [shape: bf16[2,28,128], index: 0, kind: input, shape index: {}]   ;;  %s3325_s1 = inlined_call_operand.hbm [shape: bf16[640,256], index: 1, kind: input, shape index: {}]   ;;  %s3326_s2 = inlined_call_operand.vmem [shape: f32[1,128], index: 2, kind: input, shape index: {}]   ;;  %s3327_s3 = inlined_call_operand.vmem [shape: bf16[640,128], index: 3, kind: input, shape index: {}]   ;;  %s3328_s4 = inlined_call_operand.vmem [shape: f32[1,256], index: 4, kind: input, shape index: {}]   ;;  %s3329_s5 = inlined_call_operand.vmem [shape: bf16[256,128], index: 5, kind: input, shape index: {}]   ;;  %s3330_s6 = inlined_call_operand.vmem [shape: f32[1,128], index: 6, kind: input, shape index: {}]   ;;  %s3331_s7 = inlined_call_operand.vmem [shape: bf16[128,128], index: 7, kind: input, shape index: {}]   ;;  %s3332_s8 = inlined_call_operand.vmem [shape: f32[1,128], index: 8, kind: input, shape index: {}]   ;;  %s3333_s9 = inlined_call_operand.vmem [shape: bf16[128,128], index: 9, kind: input, shape index: {}]   ;;  %s3334_s10 = inlined_call_operand.vmem [shape: f32[1,128], index: 10, kind: input, shape index: {}]   ;;  %s3335_s11 = inlined_call_operand.hbm [shape: f32[2,1,128], index: 11, kind: output, shape index: {}]  }
   0x1   :  { %17 = vsyncpa [#allocation4], 0 }
   0x2   :  { %19 = vsyncpa [#allocation4 + $0x1], 0  ;;  %s2871_s17 = smov 0   ;;  %s2873_s18 = smov 0  }
   0x3   :  { %s2875_s19 = smov 0   ;;  %s2877_s20 = smov 0  }
   0x4 LB: > { %s2892_s21 = sadd.s32 4294967295, %s2801_s20   ;;  %s2119_s22 = sadd.s32 4294967294, %s2801_s20   ;;  %s2801_s20 = sphi %s2877_s20, %s3353_s20   ;;  %s2797_s19 = sphi %s2875_s19, %s3352_s19   ;;  %s2793_s18 = sphi %s2873_s18, %s3351_s18   ;;  %s2789_s17 = sphi %s2871_s17, %s3350_s17  }
   0x5   : > { %s2896_s23 = sadd.s32 1, %s2801_s20   ;;  %s268_s24 = sadd.s32 1, %s2797_s19 }
   0x6   : > { %s265_s25 = ssub.s32 %s2801_s20, %s2896_s23  ;;  %p278_p0 = scmp.ne.s32.totalorder %s2797_s19, %s2793_s18 }
   0x7   : > { %p266_p1 = scmp.eq.s32.totalorder %s265_s25, 0  ;;  %p279_p2 = scmp.eq.s32.totalorder %s2892_s21, 1 }
   0x8   : > { %p284_p3 = scmp.ne.s32.totalorder %s2793_s18, %s2789_s17  ;;  %p285_p4 = scmp.eq.s32.totalorder %s2119_s22, 1 }
   0x9   : > { %s2907_s26 = scalar_select %p266_p1, %s2797_s19, %s268_s24  }
   0xa   : > { %p2909_p5 = por %p279_p2, %p278_p0  ;;  %p2913_p6 = por %p285_p4, %p284_p3 }
   0xb   : > { %3339 = sst [smem:[#allocation8_spill]] %s2907_s26  ;;  %p2120_p7 = scmp.ge.s32.totalorder %s2801_s20, 1 }
   0xc   : > { %s3340_s27 = scalar_select %p2909_p5, 1, 0 }
   0xd   : > { %s3341_s28 = scalar_select %p2913_p6, 1, 0 }
   0xe   : > { %p292_p8 = scmp.lt.s32.totalorder %s2801_s20, 3  ;;  %p3336_p9 = scmp.eq.s32.totalorder %s2892_s21, 0 }
   0xf   : > { %s2803_s30 = smov [#allocation2]   ;;  %s2707_s16 = scalar_lea.hbm %s3325_s1, 10240 }
  0x10   : > { %p2920_p10 = pnand %p2120_p7, %p292_p8  ;;  %s304_s12 = sshll.u32 %s2803_s30, 4  ;;  %s305_s12 = int_to_ptr.vmem [resolvable:$true] %s304_s12 }
  0x11   : > { %p2708_p13 = scmp.ne.s32.totalorder %s3325_s1, %s2707_s16  ;;  %p2714_p3 = scmp.lt.u32.totalorder %s2707_s16, %s3325_s1 }
  0x12   : > { %s3342_s29 = scalar_select %p2920_p10, 1, 0 }
  0x13   : > { %p2462_p11 = pneg %p2920_p10 }
  0x15   : > { %p2928_p12 = pnand %p3336_p9, %p2462_p11 }
  0x17   : > { %p2709_p0 = pneg %p2928_p12 }
  0x19   : > { %p2710_p1 = pnand %p2709_p0, %p2708_p13 }
  0x1b   : > { %p2711_p2 = pneg %p2710_p1 }
  0x1d   : > { %p2716_p4 = pnand %p2714_p3, %p2711_p2 }
  0x1f   : > { %2719 = shalt.err (!%p2716_p4)
}
  0x20   : > { %s2720_s26 = scalar_lea.vmem %s305_s12, 10240  ;;  %p2728_p9 = scmp.lt.s32.totalorder %s305_s12, %s305_s12 }
  0x21   : > { %p2721_p7 = scmp.ne.s32.totalorder %s305_s12, %s2720_s26  ;;  %p2729_p6 = scmp.lt.s32.totalorder %s2720_s26, %s2720_s26 }
  0x23   : > { %p2723_p8 = pnand %p2721_p7, %p2709_p0  ;;  %p2730_p5 = por %p2729_p6, %p2728_p9 }
  0x25   : > { %p2724_p11 = pneg %p2723_p8 }
  0x27   : > { %p2731_p10 = pnand %p2730_p5, %p2724_p11 }
  0x29   : > { %2734 = shalt.err (!%p2731_p10)
}
  0x2a   : > { %s2804_s14 = smov 128   ;;  %s2805_s15 = smov 8  }
  0x2b   : > { %2465 = dma.hbm_to_vmem [thread:$0]  (!%p2928_p12), %s3325_s1, 10240, %s305_s12, [#allocation3], %s2804_s14, %s2804_s14, %s2805_s15  }
  0x2c   : > { %p3344_p13 = scmp.ne.s32.totalorder %s3342_s29, 0 }
  0x2d   : > { %p3345_p1 = scmp.eq.s32.totalorder (!%p3344_p13), %s2892_s21, 0 }
  0x2e   : > { %355 = sbr.rel (%p3344_p13) target bundleno = 1651 (0x673), region = 64 }
  0x35   : > { %2780 = dma.done.wait (%p3345_p1), [#allocation3], 10240   ;;  %p3346_p0 = pmov %p3345_p1 }
  0x36   : > { %v2512_v0 = vld [vmem:[#allocation2 + $0x4] ss:$8 sps:$4 sm:$0xff]   ;;  %v2514_v1 = vld [vmem:[#allocation2] ss:$8 sps:$4 sm:$0xff]   ;;  %v2515_v2 = vld [vmem:[#allocation2 + $0x14] ss:$8 sps:$4 sm:$0xff]  }
  0x37   : > { %2782 = vsyncadd (%p3346_p0), [#allocation3], 4294957056  ;;  %1019 = vmatprep.subr.bf16.mxu0 %v2512_v0  ;;  %v2517_v3 = vld [vmem:[#allocation2 + $0x10] ss:$8 sps:$4 sm:$0xff]   ;;  %v2518_v4 = vld [vmem:[#allocation2 + $0x24] ss:$8 sps:$4 sm:$0xff]  }
  0x38   : > { %1020 = vmatpush1.bf16.msra.mxu0 %v2514_v1  ;;  %v2520_v5 = vld [vmem:[#allocation2 + $0x20] ss:$8 sps:$4 sm:$0xff]   ;;  %v2521_v6 = vld [vmem:[#allocation2 + $0x34] ss:$8 sps:$4 sm:$0xff]   ;;  %p394_p5 = scmp.lt.s32.totalorder %s2892_s21, 1  ;;  %vm597_vm1 = vcmask 1046528  }
  0x39   : > { %1021 = vmatprep.subr.bf16.mxu0 %v2515_v2  ;;  %v2523_v7 = vld [vmem:[#allocation2 + $0x30] ss:$8 sps:$4 sm:$0xff]   ;;  %v2524_v8 = vld [vmem:[#allocation2 + $0x44] ss:$8 sps:$4 sm:$0xff]   ;;  %v2526_v9 = vld [vmem:[#allocation2 + $0x40] ss:$8 sps:$4 sm:$0xff]  }
  0x3a   : > { %s395_s26 = scalar_select %p394_p5, %s2892_s21, 1  ;;  %v2527_v10 = vld [vmem:[#allocation2 + $0x54] ss:$8 sps:$4 sm:$0xff]   ;;  %v2529_v11 = vld [vmem:[#allocation2 + $0x50] ss:$8 sps:$4 sm:$0xff]   ;;  %vm613_vm2 = vcmask 1045504  }
  0x3b   : > { %v2530_v12 = vld [vmem:[#allocation2 + $0x64] ss:$8 sps:$4 sm:$0xff]   ;;  %v2532_v16 = vld [vmem:[#allocation2 + $0x60] ss:$8 sps:$4 sm:$0xff]   ;;  %v2533_v18 = vld [vmem:[#allocation2 + $0x74] ss:$8 sps:$4 sm:$0xff]  }
  0x3c   : > { %1022 = vmatpush1.bf16.msra.mxu0 %v2517_v3  ;;  %s2286_s29 = sshll.u32 %s395_s26, 4  ;;  %vm579_vm0 = vsmask.f32 7424  ;;  %v2535_v23 = vld [vmem:[#allocation2 + $0x70] ss:$8 sps:$4 sm:$0xff]   ;;  %vm2808_vm4 = vmmov 0  }
  0x3d   : > { %1023 = vmatprep.subr.bf16.mxu0 %v2518_v4  ;;  %s398_s16 = scalar_lea.vmem %s3324_s0, %s2286_s29  ;;  %v2536_v25 = vld [vmem:[#allocation2 + $0x84] ss:$8 sps:$4 sm:$0xff]   ;;  %v2538_v28 = vld [vmem:[#allocation2 + $0x80] ss:$8 sps:$4 sm:$0xff]   ;;  %v2539_v31 = vld [vmem:[#allocation2 + $0x94] ss:$8 sps:$4 sm:$0xff]  }
  0x3e   : > { %v2959_v13 = vld [vmem:[%s398_s16 + $0x8] sm:$0xf]  ;;  %v565_v14 = vld [vmem:[%s398_s16 + $0xc] sm:$0x3]  ;;  %v2961_v15 = vld [vmem:[%s398_s16] sm:$0xff]   ;;  %vm1210_vm5 = vcmask 1040384  }
  0x3f   : > { %v2964_v17 = vcombine.low %v2959_v13, %v565_v14  ;;  %v581_v19 = vshrl.u32 %v2961_v15, 16  ;;  %v583_v20 = vshll.u32 %v2961_v15, 16  ;;  %v598_v29 = vrot.slane %v2961_v15, 1  ;;  %v2541_v35 = vld [vmem:[#allocation2 + $0x90] ss:$8 sps:$4 sm:$0xff]   ;;  %s2809_s22 = smov 64  }
  0x40   : > { %1024 = vmatpush1.bf16.msra.mxu0 %v2520_v5  ;;  %v614_v33 = vrot.slane %v2961_v15, 2  ;;  %v2542_v36 = vld [vmem:[#allocation2 + $0xa4] ss:$8 sps:$4 sm:$0xff]   ;;  %v2544_v38 = vld [vmem:[#allocation2 + $0xa0] ss:$8 sps:$4 sm:$0xff]   ;;  %v2128_v0 = vcombine.low %v2959_v13, %v2959_v13  ;;  %vm1212_vm6 = vcmask 1041408  }
  0x41   : > { %1025 = vmatprep.subr.bf16.mxu0 %v2521_v6  ;;  %v588_v21 = vshll.u32 %v2964_v17, 16  ;;  %v585_v22 = vrot.slane %v583_v20, 1  ;;  %v599_v30 = vrot.slane %v2964_v17, 1  ;;  %v615_v34 = vrot.slane %v2964_v17, 2  ;;  %v2545_v39 = vld [vmem:[#allocation2 + $0xb4] ss:$8 sps:$4 sm:$0xff]  }
  0x42   : > { %v2547_v40 = vld [vmem:[#allocation2 + $0xb0] ss:$8 sps:$4 sm:$0xff]   ;;  %v2548_v41 = vld [vmem:[#allocation2 + $0xc4] ss:$8 sps:$4 sm:$0xff]   ;;  %v2550_v42 = vld [vmem:[#allocation2 + $0xc0] ss:$8 sps:$4 sm:$0xff]  }
  0x43   : > { %v590_v24 = vrot.slane %v588_v21, 1  ;;  %v586_v26 = vor.u32 %v585_v22, %v581_v19  ;;  %v2974_v32 = vsel %vm597_vm1, %v598_v29, %v599_v30  ;;  %v2981_v37 = vsel %vm613_vm2, %v614_v33, %v615_v34  ;;  %v2551_v43 = vld [vmem:[#allocation2 + $0xd4] ss:$8 sps:$4 sm:$0xff]   ;;  %v2553_v44 = vld [vmem:[#allocation2 + $0xd0] ss:$8 sps:$4 sm:$0xff]   ;;  %s392_s25 = sand.u32 1, %s2793_s18  }
  0x44   : > { %1026 = vmatpush1.bf16.msra.mxu0 %v2523_v7  ;;  %v2554_v45 = vld [vmem:[#allocation2 + $0xe4] ss:$8 sps:$4 sm:$0xff]   ;;  %v592_v46 = vshrl.u32 %v2964_v17, 16  ;;  %v2556_v47 = vld [vmem:[#allocation2 + $0xe0] ss:$8 sps:$4 sm:$0xff]   ;;  %v604_v50 = vrot.slane %v581_v19, 1 }
  0x45   : > { %1027 = vmatprep.subr.bf16.mxu0 %v2524_v8  ;;  %v591_v27 = vsel %vm579_vm0, %v586_v26, %v590_v24  ;;  %v2557_v48 = vld [vmem:[#allocation2 + $0xf4] ss:$8 sps:$4 sm:$0xff]   ;;  %v605_v51 = vrot.slane %v583_v20, 2  ;;  %v608_v52 = vrot.slane %v588_v21, 2  ;;  %v2559_v53 = vld [vmem:[#allocation2 + $0xf0] ss:$8 sps:$4 sm:$0xff]  }
  0x46   : > { %1051 = vmatprep.mubr.bf16.mxu0 %v591_v27  ;;  %v607_v49 = vrot.slane %v592_v46, 1  ;;  %v2564_v54 = vld [vmem:[#allocation2 + $0x104] ss:$8 sps:$4 sm:$0xff]   ;;  %v2562_v55 = vld [vmem:[#allocation2 + $0x100] ss:$8 sps:$4 sm:$0xff]   ;;  %v594_v57 = vor.u32 %v592_v46, %v590_v24  ;;  %v2639_v17 = vld [vmem:[%s3327_s3 + $0x50] sm:$0xff]  }
  0x47   : > { %vm603_vm3 = vsmask.f32 6400  ;;  %v2567_v56 = vld [vmem:[#allocation2 + $0x114] ss:$8 sps:$4 sm:$0xff]   ;;  %v2565_v58 = vld [vmem:[#allocation2 + $0x110] ss:$8 sps:$4 sm:$0xff]   ;;  %v606_v60 = vor.u32 %v605_v51, %v604_v50 }
  0x48   : > { %1028 = vmatpush1.bf16.msra.mxu0 %v2526_v9  ;;  %v2570_v59 = vld [vmem:[#allocation2 + $0x124] ss:$8 sps:$4 sm:$0xff]   ;;  %v2985_v61 = vor.u32 %v608_v52, %v607_v49  ;;  %v2568_v62 = vld [vmem:[#allocation2 + $0x120] ss:$8 sps:$4 sm:$0xff]   ;;  %v2573_v63 = vld [vmem:[#allocation2 + $0x134] ss:$8 sps:$4 sm:$0xff]  }
  0x49   : > { %1029 = vmatprep.subr.bf16.mxu0 %v2527_v10  ;;  %v2571_v2 = vld [vmem:[#allocation2 + $0x130] ss:$8 sps:$4 sm:$0xff]   ;;  %v2576_v3 = vld [vmem:[#allocation2 + $0x144] ss:$8 sps:$4 sm:$0xff]   ;;  %v2574_v4 = vld [vmem:[#allocation2 + $0x140] ss:$8 sps:$4 sm:$0xff]  }
  0x4a   : > { %v610_v1 = vsel %vm603_vm3, %v606_v60, %v2985_v61  ;;  %v2579_v5 = vld [vmem:[#allocation2 + $0x154] ss:$8 sps:$4 sm:$0xff]   ;;  %v2577_v6 = vld [vmem:[#allocation2 + $0x150] ss:$8 sps:$4 sm:$0xff]   ;;  %v2582_v7 = vld [vmem:[#allocation2 + $0x164] ss:$8 sps:$4 sm:$0xff]  }
  0x4b   : > { %v2580_v8 = vld [vmem:[#allocation2 + $0x160] ss:$8 sps:$4 sm:$0xff]   ;;  %v2585_v9 = vld [vmem:[#allocation2 + $0x174] ss:$8 sps:$4 sm:$0xff]   ;;  %v2583_v10 = vld [vmem:[#allocation2 + $0x170] ss:$8 sps:$4 sm:$0xff]  }
  0x4c   : > { %1030 = vmatpush1.bf16.msra.mxu0 %v2529_v11  ;;  %v2588_v11 = vld [vmem:[#allocation2 + $0x184] ss:$8 sps:$4 sm:$0xff]   ;;  %v2591_v13 = vld [vmem:[#allocation2 + $0x194] ss:$8 sps:$4 sm:$0xff]   ;;  %v2589_v14 = vld [vmem:[#allocation2 + $0x190] ss:$8 sps:$4 sm:$0xff]  }
  0x4d   : > { %1031 = vmatprep.subr.bf16.mxu0 %v2530_v12  ;;  %v2586_v12 = vld [vmem:[#allocation2 + $0x180] ss:$8 sps:$4 sm:$0xff]   ;;  %v2595_v19 = vld [vmem:[#allocation2 + $0x1b0] ss:$8 sps:$4 sm:$0xff]   ;;  %v2600_v20 = vld [vmem:[#allocation2 + $0x1c4] ss:$8 sps:$4 sm:$0xff]  }
  0x4e   : > { %v2598_v21 = vld [vmem:[#allocation2 + $0x1c0] ss:$8 sps:$4 sm:$0xff]   ;;  %v2603_v22 = vld [vmem:[#allocation2 + $0x1d4] ss:$8 sps:$4 sm:$0xff]   ;;  %v2606_v24 = vld [vmem:[#allocation2 + $0x1e4] ss:$8 sps:$4 sm:$0xff]  }
  0x4f   : > { %v2610_v26 = vld [vmem:[#allocation2 + $0x1f4] ss:$8 sps:$4 sm:$0xff]   ;;  %v2608_v27 = vld [vmem:[#allocation2 + $0x1f0] ss:$8 sps:$4 sm:$0xff]   ;;  %v2611_v29 = vld [vmem:[#allocation2 + $0x200] ss:$8 sps:$4 sm:$0xff]  }
  0x50   : > { %1032 = vmatpush1.bf16.msra.mxu0 %v2532_v16  ;;  %v2592_v16 = vld [vmem:[#allocation2 + $0x1a0] ss:$8 sps:$4 sm:$0xff]   ;;  %v2614_v33 = vld [vmem:[#allocation2 + $0x210] ss:$8 sps:$4 sm:$0xff]   ;;  %v2634_v46 = vld [vmem:[#allocation2 + $0x274] ss:$8 sps:$4 sm:$0xff]  }
  0x51   : > { %1033 = vmatprep.subr.bf16.mxu0 %v2533_v18  ;;  %v2597_v18 = vld [vmem:[#allocation2 + $0x1b4] ss:$8 sps:$4 sm:$0xff]   ;;  %v2637_v49 = vld [vmem:[%s3327_s3 + $0x48] sm:$0xff]   ;;  %v2643_v52 = vld [vmem:[%s3327_s3 + $0x60] sm:$0xff]   ;;  %vm1214_vm7 = vcmask 1042432   ;;  %vm1216_vm8 = vcmask 1043456  }
  0x52   : > { %v2641_v50 = vld [vmem:[%s3327_s3 + $0x58] sm:$0xff]   ;;  %v2651_v60 = vld [vmem:[%s3327_s3 + $0xc0] sm:$0xff]   ;;  %vm1218_vm9 = vcmask 1044480   ;;  %vm1635_vm10 = vcmask 523264   ;;  %s2283_s15 = sshll.u32 %s2892_s21, 4  ;;  %s393_s24 = scalar_lea.vmem [#allocation5], %s392_s25 }
  0x53   : > { %v2642_v51 = vld [vmem:[%s3327_s3 + $0x18] sm:$0xff]   ;;  %s2052_s26 = sshll.u32 %s393_s24, 4  ;;  %s2040_s13 = scalar_lea.sflag [#allocation4], %s392_s25  ;;  %s3284_s26 = int_to_ptr.vmem [resolvable:$true] %s2052_s26 }
  0x54   : > { %1034 = vmatpush1.bf16.msra.mxu0 %v2535_v23  ;;  %v2601_v23 = vld [vmem:[#allocation2 + $0x1d0] ss:$8 sps:$4 sm:$0xff]   ;;  %s2735_s21 = scalar_lea.vmem %s3284_s26, 16  ;;  %p3347_p9 = scmp.ne.s32.totalorder %s3340_s27, 0 }
  0x55   : > { %1035 = vmatprep.subr.bf16.mxu0 %v2536_v25  ;;  %v2604_v25 = vld [vmem:[#allocation2 + $0x1e0] ss:$8 sps:$4 sm:$0xff]   ;;  %p2736_p6 = scmp.ne.s32.totalorder %s3284_s26, %s2735_s21  ;;  %s2810_s16 = smov [#allocation5]  }
  0x56   : > { %s2739_s30 = sshll.u32 %s2810_s16, 4  ;;  %s2740_s30 = int_to_ptr.vmem [resolvable:$false] %s2739_s30 }
  0x57   : > { %p2737_p10 = pnand %p2736_p6, %p3347_p9  ;;  %s2741_s14 = scalar_lea.vmem %s2740_s30, 32 }
  0x58   : > { %1036 = vmatpush1.bf16.msra.mxu0 %v2538_v28  ;;  %v2613_v28 = vld [vmem:[#allocation2 + $0x204] ss:$8 sps:$4 sm:$0xff]   ;;  %p2742_p2 = scmp.lt.s32.totalorder %s3284_s26, %s2740_s30  ;;  %p2743_p3 = scmp.lt.s32.totalorder %s2741_s14, %s2735_s21 }
  0x59   : > { %1037 = vmatprep.subr.bf16.mxu0 %v2539_v31  ;;  %v2616_v31 = vld [vmem:[#allocation2 + $0x214] ss:$8 sps:$4 sm:$0xff]   ;;  %p2738_p12 = pneg %p2737_p10 }
  0x5a   : > { %p2744_p4 = por %p2743_p3, %p2742_p2 }
  0x5c   : > { %1038 = vmatpush1.bf16.msra.mxu0 %v2541_v35  ;;  %v2619_v35 = vld [vmem:[#allocation2 + $0x224] ss:$8 sps:$4 sm:$0xff]   ;;  %p2745_p7 = pnand %p2744_p4, %p2738_p12 }
  0x5d   : > { %1039 = vmatprep.subr.bf16.mxu0 %v2542_v36  ;;  %v2617_v36 = vld [vmem:[#allocation2 + $0x220] ss:$8 sps:$4 sm:$0xff]  }
  0x60   : > { %1040 = vmatpush1.bf16.msra.mxu0 %v2544_v38  ;;  %v2622_v38 = vld [vmem:[#allocation2 + $0x234] ss:$8 sps:$4 sm:$0xff]  }
  0x61   : > { %1041 = vmatprep.subr.bf16.mxu0 %v2545_v39  ;;  %v2620_v39 = vld [vmem:[#allocation2 + $0x230] ss:$8 sps:$4 sm:$0xff]  }
  0x64   : > { %1042 = vmatpush1.bf16.msra.mxu0 %v2547_v40  ;;  %v2806_v40 = vmov 0  }
  0x65   : > { %1043 = vmatprep.subr.bf16.mxu0 %v2548_v41  ;;  %v2625_v41 = vld [vmem:[#allocation2 + $0x244] ss:$8 sps:$4 sm:$0xff]  }
  0x68   : > { %1044 = vmatpush1.bf16.msra.mxu0 %v2550_v42  ;;  %v2628_v42 = vld [vmem:[#allocation2 + $0x254] ss:$8 sps:$4 sm:$0xff]  }
  0x69   : > { %1045 = vmatprep.subr.bf16.mxu0 %v2551_v43  ;;  %v2626_v43 = vld [vmem:[#allocation2 + $0x250] ss:$8 sps:$4 sm:$0xff]  }
  0x6c   : > { %1046 = vmatpush1.bf16.msra.mxu0 %v2553_v44  ;;  %v2631_v44 = vld [vmem:[#allocation2 + $0x264] ss:$8 sps:$4 sm:$0xff]  }
  0x6d   : > { %1047 = vmatprep.subr.bf16.mxu0 %v2554_v45  ;;  %v2629_v45 = vld [vmem:[#allocation2 + $0x260] ss:$8 sps:$4 sm:$0xff]  }
  0x70   : > { %1048 = vmatpush1.bf16.msra.mxu0 %v2556_v47  ;;  %v2635_v47 = vld [vmem:[%s3327_s3 + $0x40] sm:$0xff]  }
  0x71   : > { %1049 = vmatprep.subr.bf16.mxu0 %v2557_v48  ;;  %v2636_v48 = vld [vmem:[%s3327_s3] sm:$0xff]   ;;  %2287 = vmatprep.subr.bf16.mxu1 %v2635_v47 }
  0x72   : > { %2288 = vmatpush3.bf16.msra.mxu1 %v2636_v48 }
  0x73   : > { %2289 = vmatprep.subr.bf16.mxu1 %v2637_v49 }
  0x74   : > { %1050 = vmatpush1.bf16.msra.mxu0 %v2559_v53  ;;  %v2644_v53 = vld [vmem:[%s3327_s3 + $0x20] sm:$0xff]  }
  0x75   : > { %1070 = vmatprep.subr.bf16.mxu0 %v2564_v54  ;;  %v2645_v54 = vld [vmem:[%s3327_s3 + $0x68] sm:$0xff]  }
  0x77   : > { %1052 = vmatmul.mubr.bf16.vlgmr.msra.gmra.mrb[0].mxu0 %v2961_v15  ;;  %v2594_v15 = vld [vmem:[#allocation2 + $0x1a4] ss:$8 sps:$4 sm:$0xff]  }
  0x78   : > { %1071 = vmatpush1.bf16.msra.mxu0 %v2562_v55  ;;  %1061 = vmatprep.mubr.bf16.mxu0 %v594_v57  ;;  %v2646_v55 = vld [vmem:[%s3327_s3 + $0x28] sm:$0xff]   ;;  %v2648_v57 = vld [vmem:[%s3327_s3 + $0x30] sm:$0xff]  }
  0x79   : > { %1072 = vmatprep.subr.bf16.mxu0 %v2567_v56  ;;  %v2647_v56 = vld [vmem:[%s3327_s3 + $0x70] sm:$0xff]  }
  0x7c   : > { %1073 = vmatpush1.bf16.msra.mxu0 %v2565_v58  ;;  %v2649_v58 = vld [vmem:[%s3327_s3 + $0x78] sm:$0xff]  }
  0x7d   : > { %1074 = vmatprep.subr.bf16.mxu0 %v2570_v59  ;;  %v2650_v59 = vld [vmem:[%s3327_s3 + $0x38] sm:$0xff]  }
  0x7f   : > { %1062 = vmatmul.mubr.bf16.gmra.mrb[4].mxu0 %v2128_v0 }
  0x80   : > { %1075 = vmatpush1.bf16.msra.mxu0 %v2568_v62  ;;  %1102 = vmatprep.mubr.bf16.mxu0 %v610_v1 }
  0x81   : > { %1076 = vmatprep.subr.bf16.mxu0 %v2573_v63 }
  0x84   : > { %1077 = vmatpush1.bf16.msra.mxu0 %v2571_v2 }
  0x85   : > { %1078 = vmatprep.subr.bf16.mxu0 %v2576_v3 }
  0x88   : > { %1079 = vmatpush1.bf16.msra.mxu0 %v2574_v4 }
  0x89   : > { %1080 = vmatprep.subr.bf16.mxu0 %v2579_v5 }
  0x8c   : > { %1081 = vmatpush1.bf16.msra.mxu0 %v2577_v6 }
  0x8d   : > { %1082 = vmatprep.subr.bf16.mxu0 %v2582_v7 }
  0x90   : > { %1083 = vmatpush1.bf16.msra.mxu0 %v2580_v8 }
  0x91   : > { %1084 = vmatprep.subr.bf16.mxu0 %v2585_v9 }
  0x94   : > { %1085 = vmatpush1.bf16.msra.mxu0 %v2583_v10 }
  0x95   : > { %1086 = vmatprep.subr.bf16.mxu0 %v2588_v11 }
  0x98   : > { %1087 = vmatpush1.bf16.msra.mxu0 %v2586_v12 }
  0x99   : > { %1088 = vmatprep.subr.bf16.mxu0 %v2591_v13 }
  0x9c   : > { %1089 = vmatpush1.bf16.msra.mxu0 %v2589_v14 }
  0x9d   : > { %1090 = vmatprep.subr.bf16.mxu0 %v2594_v15 }
  0xa0   : > { %1091 = vmatpush1.bf16.msra.mxu0 %v2592_v16 }
  0xa1   : > { %1092 = vmatprep.subr.bf16.mxu0 %v2597_v18 }
  0xa4   : > { %1093 = vmatpush1.bf16.msra.mxu0 %v2595_v19 }
  0xa5   : > { %1094 = vmatprep.subr.bf16.mxu0 %v2600_v20 }
  0xa8   : > { %1095 = vmatpush1.bf16.msra.mxu0 %v2598_v21 }
  0xa9   : > { %1096 = vmatprep.subr.bf16.mxu0 %v2603_v22 }
  0xac   : > { %1097 = vmatpush1.bf16.msra.mxu0 %v2601_v23 }
  0xad   : > { %1098 = vmatprep.subr.bf16.mxu0 %v2606_v24 }
  0xb0   : > { %1099 = vmatpush1.bf16.msra.mxu0 %v2604_v25 }
  0xb1   : > { %1100 = vmatprep.subr.bf16.mxu0 %v2610_v26 }
  0xb4   : > { %1101 = vmatpush1.bf16.msra.mxu0 %v2608_v27 }
  0xb5   : > { %1121 = vmatprep.subr.bf16.mxu0 %v2613_v28 }
  0xb7   : > { %1103 = vmatmul.mubr.bf16.vlgmr.msra.gmra.mrb[0].mxu0 %v2974_v32  ;;  %v2623_v32 = vld [vmem:[#allocation2 + $0x240] ss:$8 sps:$4 sm:$0xff]  }
  0xb8   : > { %1122 = vmatpush1.bf16.msra.mxu0 %v2611_v29  ;;  %1112 = vmatprep.mubr.bf16.mxu0 %v2985_v61  ;;  %v2807_v61 = vmov 0.0  }
  0xb9   : > { %1123 = vmatprep.subr.bf16.mxu0 %v2616_v31  ;;  %v2210_v31 = vld [vmem:[%s3326_s2] ss:$0 sm:$0xff] }
  0xbc   : > { %1124 = vmatpush1.bf16.msra.mxu0 %v2614_v33 }
  0xbd   : > { %1125 = vmatprep.subr.bf16.mxu0 %v2619_v35 }
  0xbf   : > { %1113 = vmatmul.mubr.bf16.gmra.mrb[4].mxu0 %v599_v30  ;;  %v2632_v30 = vld [vmem:[#allocation2 + $0x270] ss:$8 sps:$4 sm:$0xff]  }
  0xc0   : > { %1126 = vmatpush1.bf16.msra.mxu0 %v2617_v36  ;;  %1153 = vmatprep.mubr.bf16.mxu0 %v2806_v40 }
  0xc1   : > { %1127 = vmatprep.subr.bf16.mxu0 %v2622_v38 }
  0xc4   : > { %1128 = vmatpush1.bf16.msra.mxu0 %v2620_v39 }
  0xc5   : > { %1129 = vmatprep.subr.bf16.mxu0 %v2625_v41 }
  0xc8   : > { %1130 = vmatpush1.bf16.msra.mxu0 %v2623_v32 }
  0xc9   : > { %1131 = vmatprep.subr.bf16.mxu0 %v2628_v42 }
  0xcc   : > { %1132 = vmatpush1.bf16.msra.mxu0 %v2626_v43 }
  0xcd   : > { %1133 = vmatprep.subr.bf16.mxu0 %v2631_v44 }
  0xd0   : > { %1134 = vmatpush1.bf16.msra.mxu0 %v2629_v45 }
  0xd1   : > { %1135 = vmatprep.subr.bf16.mxu0 %v2634_v46 }
  0xd4   : > { %1136 = vmatpush1.bf16.msra.mxu0 %v2632_v30 }
  0xd5   : > { %2420 = vmatprep.subr.bf16.mxu0 %v2807_v61 }
  0xd7   : > { %1154 = vmatmul.mubr.bf16.vlgmr.msra.gmra.mrb[0].mxu0 %v2981_v37  ;;  %v2638_v37 = vld [vmem:[%s3327_s3 + $0x8] sm:$0xff]  }
  0xd8   : > { %1163 = vmatprep.mubr.bf16.mxu0 %v2806_v40  ;;  %2290 = vmatpush3.bf16.msra.mxu1 %v2638_v37  ;;  %v2652_v37 = vld [vmem:[%s3327_s3 + $0x80] sm:$0xff]  }
  0xd9   : > { %2291 = vmatprep.subr.bf16.mxu1 %v2639_v17  ;;  %v2653_v17 = vld [vmem:[%s3327_s3 + $0xc8] sm:$0xff]  }
  0xdf   : > { %1164 = vmatmul.mubr.bf16.gmra.mrb[4].mxu0 %v615_v34  ;;  %v2640_v34 = vld [vmem:[%s3327_s3 + $0x10] sm:$0xff]  }
  0xe0   : > { %2292 = vmatpush3.bf16.msra.mxu1 %v2640_v34  ;;  %2436 = vmatprep.mubr.msk.bf16.mxu0 %vm2808_vm4, %v2807_v61 }
  0xe1   : > { %2293 = vmatprep.subr.bf16.mxu1 %v2641_v50  ;;  %v2654_v50 = vld [vmem:[%s3327_s3 + $0x88] sm:$0xff]  }
  0xe4   : > { %2294 = vmatpush3.bf16.msra.mxu1 %v2642_v51  ;;  %v2655_v51 = vld [vmem:[%s3327_s3 + $0xd0] sm:$0xff]  }
  0xe5   : > { %2295 = vmatprep.subr.bf16.mxu1 %v2643_v52  ;;  %v2656_v52 = vld [vmem:[%s3327_s3 + $0x90] sm:$0xff]  }
  0xe8   : > { %2296 = vmatpush3.bf16.msra.mxu1 %v2644_v53  ;;  %v2657_v53 = vld [vmem:[%s3327_s3 + $0xd8] sm:$0xff]  }
  0xe9   : > { %2297 = vmatprep.subr.bf16.mxu1 %v2645_v54  ;;  %v2658_v54 = vld [vmem:[%s3327_s3 + $0x98] sm:$0xff]  }
  0xec   : > { %2298 = vmatpush3.bf16.msra.mxu1 %v2646_v55  ;;  %v2659_v55 = vld [vmem:[%s3327_s3 + $0xe0] sm:$0xff]  }
  0xed   : > { %2299 = vmatprep.subr.bf16.mxu1 %v2647_v56  ;;  %v2660_v56 = vld [vmem:[%s3327_s3 + $0xa0] sm:$0xff]  }
  0xf0   : > { %2300 = vmatpush3.bf16.msra.mxu1 %v2648_v57  ;;  %v2661_v57 = vld [vmem:[%s3327_s3 + $0xe8] sm:$0xff]  }
  0xf1   : > { %2301 = vmatprep.subr.bf16.mxu1 %v2649_v58  ;;  %v2662_v58 = vld [vmem:[%s3327_s3 + $0xa8] sm:$0xff]  }
  0xf4   : > { %2302 = vmatpush3.bf16.msra.mxu1 %v2650_v59  ;;  %v2663_v59 = vld [vmem:[%s3327_s3 + $0xf0] sm:$0xff]  }
  0xf5   : > { %2309 = vmatprep.subr.bf16.mxu1 %v2651_v60  ;;  %v2664_v60 = vld [vmem:[%s3327_s3 + $0xb0] sm:$0xff]  }
 0x1aa   : > { %v1155_v62 = vpop.f32.mrb[0].mxu0 }
 0x1ab   : > { %v1157_v63 = vpop.f32.mrb[1].mxu0 }
 0x1ac   : > { %v1172_v0 = vmax.f32 %v1155_v62, %v1157_v63  ;;  %v1159_v1 = vpop.f32.mrb[2].mxu0  ;;  %v2665_v62 = vld [vmem:[%s3327_s3 + $0xf8] sm:$0xff]  }
 0x1ad   : > { %v1161_v2 = vpop.f32.mrb[3].mxu0  ;;  %v2666_v63 = vld [vmem:[%s3327_s3 + $0xb8] sm:$0xff]  }
 0x1ae   : > { %v1176_v3 = vrot.slane %v1172_v0, 1  ;;  %v1173_v4 = vmax.f32 %v1159_v1, %v1161_v2  ;;  %v2668_v2 = vld [vmem:[%s3327_s3 + $0x108] sm:$0xff]  }
 0x1b0   : > { %v1178_v5 = vmax.f32 %v1172_v0, %v1176_v3  ;;  %v1180_v6 = vrot.slane %v1173_v4, 1  ;;  %v2667_v0 = vld [vmem:[%s3327_s3 + $0x100] sm:$0xff]   ;;  %v2669_v3 = vld [vmem:[%s3327_s3 + $0x110] sm:$0xff]  }
 0x1b2   : > { %v1188_v7 = vrot.slane %v1178_v5, 1  ;;  %v1190_v8 = vrot.slane %v1178_v5, 2  ;;  %v1182_v9 = vmax.f32 %v1173_v4, %v1180_v6  ;;  %v1165_v10 = vpop.f32.mrb[4].mxu0  ;;  %v1192_v12 = vrot.slane %v1178_v5, 3  ;;  %v2670_v4 = vld [vmem:[%s3327_s3 + $0x118] sm:$0xff]   ;;  %v2672_v6 = vld [vmem:[%s3327_s3 + $0x128] sm:$0xff]  }
 0x1b3   : > { %v1167_v11 = vpop.f32.mrb[5].mxu0 }
 0x1b4   : > { %v1211_v13 = vsel %vm1210_vm5, %v1178_v5, %v1188_v7  ;;  %v1195_v14 = vrot.slane %v1182_v9, 4  ;;  %v1169_v15 = vpop.f32.mrb[6].mxu0  ;;  %v1174_v18 = vmax.f32 %v1165_v10, %v1167_v11  ;;  %v1197_v21 = vrot.slane %v1182_v9, 5  ;;  %v2671_v5 = vld [vmem:[%s3327_s3 + $0x120] sm:$0xff]   ;;  %v2673_v7 = vld [vmem:[%s3327_s3 + $0x130] sm:$0xff]  }
 0x1b5   : > { %v1213_v16 = vsel %vm1212_vm6, %v1211_v13, %v1190_v8  ;;  %v1170_v19 = vpop.f32.mrb[7].mxu0  ;;  %v1199_v22 = vrot.slane %v1182_v9, 6  ;;  %v1201_v25 = vrot.slane %v1182_v9, 7  ;;  %v2674_v8 = vld [vmem:[%s3327_s3 + $0x138] sm:$0xff]  }
 0x1b6   : > { %v1215_v20 = vsel %vm1214_vm7, %v1213_v16, %v1192_v12  ;;  %v1184_v24 = vrot.slane %v1174_v18, 1 }
 0x1b7   : > { %v1217_v23 = vsel %vm1216_vm8, %v1215_v20, %v1195_v14 }
 0x1b8   : > { %v1219_v26 = vsel %vm1218_vm9, %v1217_v23, %v1197_v21  ;;  %v1186_v28 = vmax.f32 %v1174_v18, %v1184_v24  ;;  %v2676_v23 = vld [vmem:[%s3329_s5] sm:$0xff]   ;;  %v2677_v24 = vld [vmem:[%s3329_s5 + $0x48] sm:$0xff]  }
 0x1b9   : > { %v1221_v27 = vsel %vm613_vm2, %v1219_v26, %v1199_v22  ;;  %v2675_v22 = vld [vmem:[%s3329_s5 + $0x40] sm:$0xff]  }
 0x1ba   : > { %v1223_v29 = vsel %vm597_vm1, %v1221_v27, %v1201_v25  ;;  %v1204_v33 = vrot.slane %v1186_v28, 1  ;;  %v1206_v35 = vrot.slane %v1186_v28, 2  ;;  %v1208_v36 = vrot.slane %v1186_v28, 3 }
 0x1bb   : > { %v1233_v39 = vadd.f32 %v2210_v31, %v1223_v29 }
 0x1bc   : > { %v1224_v38 = vsel %vm1210_vm5, %v1186_v28, %v1204_v33  ;;  %v2678_v28 = vld [vmem:[%s3329_s5 + $0x8] sm:$0xff]  }
 0x1bd   : > { %v1225_v40 = vsel %vm1212_vm6, %v1224_v38, %v1206_v35  ;;  %v1235_v42 = vmax.f32 %v1233_v39, 0.0  ;;  %v2680_v35 = vld [vmem:[%s3329_s5 + $0x10] sm:$0xff]   ;;  %v2682_v38 = vld [vmem:[%s3329_s5 + $0x18] sm:$0xff]   ;;  %v2683_v39 = vld [vmem:[%s3329_s5 + $0x60] sm:$0xff]  }
 0x1be   : > { %v1226_v41 = vsel %vm1214_vm7, %v1225_v40, %v1208_v36  ;;  %v2681_v36 = vld [vmem:[%s3329_s5 + $0x58] sm:$0xff]   ;;  %v2684_v40 = vld [vmem:[%s3329_s5 + $0x20] sm:$0xff]  }
 0x1bf   : > { %v1234_v32 = vadd.f32 %v2210_v31, %v1226_v41  ;;  %v2679_v31 = vld [vmem:[%s3329_s5 + $0x50] sm:$0xff]   ;;  %v2685_v41 = vld [vmem:[%s3329_s5 + $0x68] sm:$0xff]  }
 0x1c1   : > { %v1236_v43 = vmax.f32 %v1234_v32, 0.0  ;;  %v2686_v32 = vld [vmem:[%s3329_s5 + $0x28] sm:$0xff]  }
 0x1c3   : > { %v3063_v44 = vpack.c.bf16 %v1236_v43, %v1235_v42  ;;  %v2687_v42 = vld [vmem:[%s3329_s5 + $0x70] sm:$0xff]  }
 0x1c4   : > { %v2688_v43 = vld [vmem:[%s3329_s5 + $0x30] sm:$0xff]  }
 0x1c5   : > { %v1239_v45 = vshrl.u32 %v3063_v44, 16  ;;  %v1241_v46 = vshll.u32 %v3063_v44, 16  ;;  %v1247_v1 = vrot.slane %v3063_v44, 1  ;;  %v1253_v9 = vrot.slane %v3063_v44, 2 }
 0x1c7   : > { %v1243_v30 = vrot.slane %v1241_v46, 1  ;;  %v1249_v47 = vrot.slane %v1239_v45, 1  ;;  %v1250_v48 = vrot.slane %v1241_v46, 2 }
 0x1c9   : > { %v1244_v49 = vor.u32 %v1243_v30, %v1239_v45  ;;  %v1251_v34 = vor.u32 %v1250_v48, %v1249_v47  ;;  %v2690_v45 = vld [vmem:[%s3329_s5 + $0x38] sm:$0xff]  }
 0x1cb   : > { %1527 = vmatprep.mubr.bf16.mxu1 %v1244_v49 }
 0x1cc   : > { %1528 = vmatmul.mubr.bf16.vlgmr.msra.gmra.mrb[0].mxu1 %v3063_v44  ;;  %v2689_v44 = vld [vmem:[%s3329_s5 + $0x78] sm:$0xff]  }
 0x1cd   : > { %2310 = vmatpush3.bf16.msra.mxu1 %v2652_v37  ;;  %1567 = vmatprep.mubr.bf16.mxu1 %v1251_v34 }
 0x1ce   : > { %2311 = vmatprep.subr.bf16.mxu1 %v2653_v17  ;;  %v1639_v17 = vlaneseq }
 0x1d0   : > { %v1640_v34 = vshrl.u32 %v1639_v17, 7 }
 0x1d1   : > { %2312 = vmatpush3.bf16.msra.mxu1 %v2654_v50 }
 0x1d2   : > { %2313 = vmatprep.subr.bf16.mxu1 %v2655_v51  ;;  %v1645_v50 = vsub.s32 1, %v1640_v34  ;;  %v1641_v51 = vsub.s32 0, %v1640_v34 }
 0x1d5   : > { %2314 = vmatpush3.bf16.msra.mxu1 %v2656_v52  ;;  %v561_v52 = vld [vmem:[%s3328_s4] sm:$0x3] }
 0x1d6   : > { %2315 = vmatprep.subr.bf16.mxu1 %v2657_v53  ;;  %v1646_v53 = vrot.slane %v561_v52, %v1645_v50 }
 0x1d9   : > { %2316 = vmatpush3.bf16.msra.mxu1 %v2658_v54  ;;  %v1642_v54 = vrot.slane %v561_v52, %v1641_v51 }
 0x1da   : > { %2317 = vmatprep.subr.bf16.mxu1 %v2659_v55 }
 0x1dd   : > { %2318 = vmatpush3.bf16.msra.mxu1 %v2660_v56 }
 0x1de   : > { %2319 = vmatprep.subr.bf16.mxu1 %v2661_v57 }
 0x1e1   : > { %2320 = vmatpush3.bf16.msra.mxu1 %v2662_v58 }
 0x1e2   : > { %2321 = vmatprep.subr.bf16.mxu1 %v2663_v59 }
 0x1e5   : > { %2322 = vmatpush3.bf16.msra.mxu1 %v2664_v60 }
 0x1e6   : > { %2323 = vmatprep.subr.bf16.mxu1 %v2665_v62 }
 0x1e9   : > { %2324 = vmatpush3.bf16.msra.mxu1 %v2666_v63 }
 0x1ea   : > { %2380 = vmatprep.subr.bf16.mxu1 %v2807_v61 }
 0x1ec   : > { %1568 = vmatmul.mubr.bf16.vlgmr.msra.gmra.mrb[4].mxu1 %v1247_v1 }
 0x1ed   : > { %2381 = vmatpush3.bf16.msra.mxu1 %v2667_v0  ;;  %2396 = vmatprep.mubr.msk.bf16.mxu1 %vm2808_vm4, %v2807_v61 }
 0x1ee   : > { %2382 = vmatprep.subr.bf16.mxu1 %v2807_v61 }
 0x1f1   : > { %2383 = vmatpush3.bf16.msra.mxu1 %v2668_v2 }
 0x1f2   : > { %2384 = vmatprep.subr.bf16.mxu1 %v2807_v61 }
 0x1f5   : > { %2385 = vmatpush3.bf16.msra.mxu1 %v2669_v3  ;;  %v2691_v3 = vld [vmem:[%s3331_s7] sm:$0xff]  }
 0x1f6   : > { %2386 = vmatprep.subr.bf16.mxu1 %v2807_v61 }
 0x1f9   : > { %2387 = vmatpush3.bf16.msra.mxu1 %v2670_v4  ;;  %v2692_v4 = vld [vmem:[%s3331_s7 + $0x8] sm:$0xff]  }
 0x1fa   : > { %2388 = vmatprep.subr.bf16.mxu1 %v2807_v61 }
 0x1fd   : > { %2389 = vmatpush3.bf16.msra.mxu1 %v2671_v5  ;;  %v2693_v5 = vld [vmem:[%s3331_s7 + $0x10] sm:$0xff]  }
 0x1fe   : > { %2390 = vmatprep.subr.bf16.mxu1 %v2807_v61 }
 0x201   : > { %2391 = vmatpush3.bf16.msra.mxu1 %v2672_v6  ;;  %v2694_v6 = vld [vmem:[%s3331_s7 + $0x18] sm:$0xff]  }
 0x202   : > { %2392 = vmatprep.subr.bf16.mxu1 %v2807_v61 }
 0x205   : > { %2393 = vmatpush3.bf16.msra.mxu1 %v2673_v7  ;;  %v2695_v7 = vld [vmem:[%s3331_s7 + $0x20] sm:$0xff]  }
 0x206   : > { %2394 = vmatprep.subr.bf16.mxu1 %v2807_v61 }
 0x209   : > { %2395 = vmatpush3.bf16.msra.mxu1 %v2674_v8  ;;  %v2696_v8 = vld [vmem:[%s3331_s7 + $0x28] sm:$0xff]  }
 0x20a   : > { %2340 = vmatprep.subr.bf16.mxu1 %v2675_v22 }
 0x20c   : > { %2397 = vmatmul.mubr.bf16.vlgmr.msra.gmra.mrb[8].mxu1 %v1253_v9  ;;  %v2697_v9 = vld [vmem:[%s3331_s7 + $0x30] sm:$0xff]  }
 0x20d   : > { %2341 = vmatpush3.bf16.msra.mxu1 %v2676_v23 }
 0x20e   : > { %2342 = vmatprep.subr.bf16.mxu1 %v2677_v24 }
 0x211   : > { %2343 = vmatpush3.bf16.msra.mxu1 %v2678_v28  ;;  %v2706_v28 = vld [vmem:[%s3333_s9 + $0x38] sm:$0xff]  }
 0x212   : > { %2344 = vmatprep.subr.bf16.mxu1 %v2679_v31 }
 0x215   : > { %2345 = vmatpush3.bf16.msra.mxu1 %v2680_v35 }
 0x216   : > { %2346 = vmatprep.subr.bf16.mxu1 %v2681_v36 }
 0x219   : > { %2347 = vmatpush3.bf16.msra.mxu1 %v2682_v38 }
 0x21a   : > { %2348 = vmatprep.subr.bf16.mxu1 %v2683_v39 }
 0x21d   : > { %2349 = vmatpush3.bf16.msra.mxu1 %v2684_v40 }
 0x21e   : > { %2350 = vmatprep.subr.bf16.mxu1 %v2685_v41 }
 0x221   : > { %2351 = vmatpush3.bf16.msra.mxu1 %v2686_v32 }
 0x222   : > { %2352 = vmatprep.subr.bf16.mxu1 %v2687_v42 }
 0x225   : > { %2353 = vmatpush3.bf16.msra.mxu1 %v2688_v43 }
 0x226   : > { %2354 = vmatprep.subr.bf16.mxu1 %v2689_v44 }
 0x229   : > { %2355 = vmatpush3.bf16.msra.mxu1 %v2690_v45 }
 0x22a   : > { %2400 = vmatprep.subr.bf16.mxu1 %v2807_v61 }
 0x29f   : > { %v2303_v10 = vpop.f32.mrb[0].mxu1 }
 0x2a0   : > { %v2304_v11 = vpop.f32.mrb[1].mxu1 }
 0x2a1   : > { %v2305_v12 = vadd.f32 %v2304_v11, %v2303_v10  ;;  %v2306_v13 = vpop.f32.mrb[2].mxu1  ;;  %v2698_v10 = vld [vmem:[%s3331_s7 + $0x38] sm:$0xff]   ;;  %v2699_v11 = vld [vmem:[%s3333_s9] sm:$0xff]  }
 0x2a2   : > { %v2307_v14 = vpop.f32.mrb[3].mxu1  ;;  %2421 = vmatpush3.bf16.msra.mxu0 %v2699_v11  ;;  %v2701_v13 = vld [vmem:[%s3333_s9 + $0x10] sm:$0xff]  }
 0x2a3   : > { %2422 = vmatprep.subr.bf16.mxu0 %v2807_v61  ;;  %v2702_v14 = vld [vmem:[%s3333_s9 + $0x18] sm:$0xff]  }
 0x2bf   : > { %v2325_v15 = vpop.f32.mrb[4].mxu1 }
 0x2c0   : > { %v2326_v16 = vpop.f32.mrb[5].mxu1 }
 0x2c1   : > { %v2327_v18 = vadd.f32 %v2326_v16, %v2325_v15  ;;  %v2328_v19 = vpop.f32.mrb[6].mxu1  ;;  %v2703_v15 = vld [vmem:[%s3333_s9 + $0x20] sm:$0xff]   ;;  %v2704_v16 = vld [vmem:[%s3333_s9 + $0x28] sm:$0xff]  }
 0x2c2   : > { %v2329_v20 = vpop.f32.mrb[7].mxu1  ;;  %v1687_v19 = vld [vmem:[%s3330_s6] sm:$0x1] }
 0x2c3   : > { %v1570_v21 = vadd.f32 %v2327_v18, %v2305_v12  ;;  %v2700_v12 = vld [vmem:[%s3333_s9 + $0x8] sm:$0xff]  }
 0x2c4   : > { %2423 = vmatpush3.bf16.msra.mxu0 %v2700_v12 }
 0x2c5   : > { %2424 = vmatprep.subr.bf16.mxu0 %v2807_v61 }
 0x2c8   : > { %2425 = vmatpush3.bf16.msra.mxu0 %v2701_v13 }
 0x2c9   : > { %2426 = vmatprep.subr.bf16.mxu0 %v2807_v61 }
 0x2cc   : > { %2427 = vmatpush3.bf16.msra.mxu0 %v2702_v14 }
 0x2cd   : > { %2428 = vmatprep.subr.bf16.mxu0 %v2807_v61 }
 0x2d0   : > { %2429 = vmatpush3.bf16.msra.mxu0 %v2703_v15 }
 0x2d1   : > { %2430 = vmatprep.subr.bf16.mxu0 %v2807_v61 }
 0x2d4   : > { %2431 = vmatpush3.bf16.msra.mxu0 %v2704_v16 }
 0x2d5   : > { %2432 = vmatprep.subr.bf16.mxu0 %v2807_v61 }
 0x2df   : > { %v1609_v25 = vpop.f32.mrb[8].mxu1 }
 0x2e0   : > { %v1610_v26 = vadd.f32 %v1609_v25, %v1570_v21  ;;  %v2398_v27 = vpop.f32.mrb[9].mxu1 }
 0x2e1   : > { %v1612_v29 = vpop.f32.mrb[10].mxu1  ;;  %v2705_v27 = vld [vmem:[%s3333_s9 + $0x30] sm:$0xff]  }
 0x2e2   : > { %v2399_v33 = vpop.f32.mrb[11].mxu1  ;;  %1616 = vrot.lane.b32.xlu0 %v1610_v26, %s2809_s22  ;;  %2433 = vmatpush3.bf16.msra.mxu0 %v2705_v27  ;;  %v1704_v29 = vld [vmem:[%s3332_s8] sm:$0x1] }
 0x2e3   : > { %2434 = vmatprep.subr.bf16.mxu0 %v2807_v61 }
 0x2e6   : > { %2435 = vmatpush3.bf16.msra.mxu0 %v2706_v28 }
 0x354   : > { %v1617_v46 = vpop.permute.xlu0 %1616 }
 0x355   : > { %v1619_v30 = vmax.f32 %v1610_v26, %v1617_v46 }
 0x357   : > { %v1621_v47 = vrot.slane %v1619_v30, 1 }
 0x359   : > { %v1623_v48 = vmax.f32 %v1619_v30, %v1621_v47 }
 0x35b   : > { %v1631_v49 = vrot.slane %v1623_v48, 6  ;;  %v1625_v37 = vrot.slane %v1623_v48, 2  ;;  %v1629_v55 = vrot.slane %v1623_v48, 4 }
 0x35d   : > { %1632 = vrot.lane.b32.xlu0 %v1631_v49, %s2809_s22  ;;  %1626 = vrot.lane.b32.xlu1 %v1625_v37, %s2809_s22  ;;  %s3282_s22 = scalar_lea.hbm %s3335_s11, %s2283_s15 }
 0x3cf   : > { %v1633_v56 = vpop.permute.xlu0 %1632  ;;  %v1627_v57 = vpop.permute.xlu1 %1626 }
 0x3d0   : > { %v1637_v58 = vsel %vm1635_vm10, %v1629_v55, %v1633_v56  ;;  %v1636_v59 = vsel %vm1635_vm10, %v1623_v48, %v1627_v57 }
 0x3d1   : > { %v1650_v60 = vadd.f32 %v1646_v53, %v1637_v58  ;;  %v1649_v62 = vadd.f32 %v1642_v54, %v1636_v59 }
 0x3d3   : > { %v1652_v63 = vmax.f32 %v1650_v60, 0.0  ;;  %v1651_v0 = vmax.f32 %v1649_v62, 0.0 }
 0x3d5   : > { %v1654_v1 = vpack.c.bf16 %v1652_v63, %v1652_v63  ;;  %v1653_v2 = vpack.c.bf16 %v1651_v0, %v1651_v0 }
 0x3d7   : > { %1850 = vmatprep.mubr.bf16.mxu1 %v1654_v1 }
 0x3d8   : > { %1851 = vmatmul.mubr.bf16.vlgmr.msra.gmra.mrb[12].mxu1 %v1653_v2 }
 0x3d9   : > { %2401 = vmatpush3.bf16.msra.mxu1 %v2691_v3  ;;  %2416 = vmatprep.mubr.msk.bf16.mxu1 %vm2808_vm4, %v2807_v61 }
 0x3da   : > { %2402 = vmatprep.subr.bf16.mxu1 %v2807_v61 }
 0x3dd   : > { %2403 = vmatpush3.bf16.msra.mxu1 %v2692_v4 }
 0x3de   : > { %2404 = vmatprep.subr.bf16.mxu1 %v2807_v61 }
 0x3e1   : > { %2405 = vmatpush3.bf16.msra.mxu1 %v2693_v5 }
 0x3e2   : > { %2406 = vmatprep.subr.bf16.mxu1 %v2807_v61 }
 0x3e5   : > { %2407 = vmatpush3.bf16.msra.mxu1 %v2694_v6 }
 0x3e6   : > { %2408 = vmatprep.subr.bf16.mxu1 %v2807_v61 }
 0x3e9   : > { %2409 = vmatpush3.bf16.msra.mxu1 %v2695_v7 }
 0x3ea   : > { %2410 = vmatprep.subr.bf16.mxu1 %v2807_v61 }
 0x3ed   : > { %2411 = vmatpush3.bf16.msra.mxu1 %v2696_v8 }
 0x3ee   : > { %2412 = vmatprep.subr.bf16.mxu1 %v2807_v61 }
 0x3f1   : > { %2413 = vmatpush3.bf16.msra.mxu1 %v2697_v9 }
 0x3f2   : > { %2414 = vmatprep.subr.bf16.mxu1 %v2807_v61  ;;  %v1721_v61 = vld [vmem:[%s3334_s10] sm:$0x1] }
 0x3f5   : > { %2415 = vmatpush3.bf16.msra.mxu1 %v2698_v10 }
 0x4ab   : > { %v2356_v18 = vpop.f32.mrb[12].mxu1 }
 0x4ac   : > { %v2357_v20 = vpop.f32.mrb[13].mxu1 }
 0x4ad   : > { %v2358_v21 = vadd.f32 %v2357_v20, %v2356_v18  ;;  %v2359_v22 = vpop.f32.mrb[14].mxu1 }
 0x4ae   : > { %v2360_v23 = vpop.f32.mrb[15].mxu1 }
 0x4af   : > { %v1853_v24 = vadd.f32 %v2358_v21, %v1687_v19 }
 0x4b1   : > { %v1858_v25 = vmax.f32 %v1853_v24, 0.0 }
 0x4b3   : > { %v1859_v26 = vpack.c.bf16 %v1858_v25, %v1858_v25 }
 0x4b5   : > { %2417 = vmatmul.mubr.bf16.vlgmr.msra.gmra.mrb[16].mxu1 %v1859_v26 }
 0x588   : > { %v1942_v31 = vpop.f32.mrb[16].mxu1 }
 0x589   : > { %v1943_v33 = vadd.f32 %v1942_v31, %v1704_v29  ;;  %v2418_v35 = vpop.f32.mrb[17].mxu1 }
 0x58a   : > { %v1945_v36 = vpop.f32.mrb[18].mxu1 }
 0x58b   : > { %v1948_v38 = vmax.f32 %v1943_v33, 0.0  ;;  %v2419_v39 = vpop.f32.mrb[19].mxu1 }
 0x58d   : > { %v1949_v40 = vpack.c.bf16 %v1948_v38, %v1948_v38 }
 0x58f   : > { %2437 = vmatmul.mubr.bf16.vlgmr.msra.gmra.mrb[8].mxu0 %v1949_v40 }
 0x662   : > { %v2032_v41 = vpop.f32.mrb[8].mxu0 }
 0x663   : > { %v2033_v32 = vadd.f32 %v2032_v41, %v1721_v61  ;;  %v2438_v42 = vpop.f32.mrb[9].mxu0 }
 0x664   : > { %v2035_v43 = vpop.f32.mrb[10].mxu0 }
 0x665   : > { %2038 = vst [vmem:[%s393_s24] sm:$0x1] %v2033_v32  ;;  %v2439_v44 = vpop.f32.mrb[11].mxu0 }
 0x666   : > { %2748 = shalt.err (!%p2745_p7)
}
 0x667   : > { %s2749_s25 = scalar_lea.hbm %s3282_s22, 16  ;;  %s2753_s29 = scalar_lea.hbm %s3335_s11, 32 }
 0x668   : > { %p2750_p8 = scmp.ne.s32.totalorder %s3282_s22, %s2749_s25  ;;  %p2754_p1 = scmp.lt.u32.totalorder %s3282_s22, %s3335_s11 }
 0x669   : > { %p2755_p0 = scmp.lt.u32.totalorder %s2753_s29, %s2749_s25  ;;  %p2757_p6 = scmp.lt.u32.totalorder %s2749_s25, %s3282_s22 }
 0x66a   : > { %p2751_p11 = pnand %p2750_p8, %p3347_p9 }
 0x66b   : > { %p2756_p5 = por %p2755_p0, %p2754_p1 }
 0x66c   : > { %p2752_p13 = pneg %p2751_p11 }
 0x66d   : > { %p2758_p10 = por %p2757_p6, %p2756_p5 }
 0x66f   : > { %p2759_p12 = pnand %p2758_p10, %p2752_p13 }
 0x671   : > { %2762 = shalt.err (!%p2759_p12)
}
 0x672   : > { %2460 = dma.vmem_to_hbm [thread:$0]  (%p3347_p9), %s3284_s26, 16, %s3282_s22, %s2040_s13  }
 0x673 PF: > { %p2472_p2 = scmp.ge.s32.totalorder %s2801_s20, 2  ;;  %s2064_s21 = sand.u32 1, %s2789_s17  }
 0x674   : > { %p3348_p3 = scmp.ne.s32.totalorder %s3341_s28, 0  ;;  %s2065_s30 = scalar_lea.sflag [#allocation4], %s2064_s21 }
 0x676   : > { %p2467_p4 = pnand %p2472_p2, %p3348_p3 }
 0x678   : > { %2784 = dma.done.wait (!%p2467_p4), %s2065_s30, 16  }
 0x679   : > { %2786 = vsyncadd (!%p2467_p4), %s2065_s30, 4294967280  ;;  %s3349_s14 = sld [smem:[#allocation8_spill]]  ;;  %p22_p7 = scmp.ge.s32.totalorder %s2896_s23, 4  }
 0x67a   : > { %s3350_s17 = smov %s2793_s18  ;;  %s3351_s18 = smov %s2797_s19 }
 0x67b   : > { %s3353_s20 = smov %s2896_s23  ;;  %24 = sbr.rel (!%p22_p7) target bundleno = 4 (0x4), region = 104 }
 0x67f   : > { %s3352_s19 = smov %s3349_s14 }
 0x682   :  { %2069 = vsyncpa [#allocation3], 1 }
 0x683   :  { %2071 = vsyncpa [#allocation3 + $0x1], 1 }
 0x684   :  { %2072 = vsyncpa [#allocation4], 1 }
 0x685   :  { %2074 = vsyncpa [#allocation4 + $0x1], 1 }

</bundles_post_ra>
